<compile_context>
chip_gen: v6e
topology: v6e:2x2x1
jax: 0.10.0
libtpu: 0.0.40
codegen_flags: <defaults>
</compile_context>

<pallas_src>
import functools

import jax
import jax.numpy as jnp
import numpy as np
from jax import lax
from jax.experimental import pallas as pl
from jax.experimental.pallas import tpu as pltpu


# ----------------------------------------------------------------------------
# Fused kernel: projection + dynamic sampler + grid_sample (separable bilinear)
# ----------------------------------------------------------------------------
def _fused_render_kernel(cam_ref, fverts_ref, img_ref, tex_ref, samp_ref,
                         *, H, W, C, TT, coords0, coords1):
    b = pl.program_id(0)
    scale = cam_ref[b, 0]
    tx = cam_ref[b, 1]
    ty = cam_ref[b, 2]

    fv = fverts_ref[...]                       # (6, Ft)  [x0,x1,x2,y0,y1,y2]
    img = img_ref[...]                         # (C*H, W)

    # batch_orth_proj_idrot: scale * (xy + trans); lane dim = faces
    px = scale * (fv[0:3, :] + tx)             # (3, Ft)
    py = scale * (fv[3:6, :] + ty)             # (3, Ft)

    dx0 = px[0:1, :] - px[2:3, :]
    dx1 = px[1:2, :] - px[2:3, :]
    x2 = px[2:3, :]
    dy0 = py[0:1, :] - py[2:3, :]
    dy1 = py[1:2, :] - py[2:3, :]
    y2 = py[2:3, :]

    # Static tap-index grids (once per grid step, outside the TT loop).
    rows = lax.broadcasted_iota(jnp.int32, (H, fv.shape[-1]), 0).astype(jnp.float32)
    cols = lax.broadcasted_iota(jnp.int32, (W, fv.shape[-1]), 0).astype(jnp.float32)

    for t in range(TT):                        # TT = tex_size**2 (static unroll)
        a = coords0[t]
        c = coords1[t]

        # points_to_sampler: [v0v2 v1v2] @ coords + v2, clamp to [-1, 1]
        sx = jnp.clip(dx0 * a + dx1 * c + x2, -1.0, 1.0)   # (1, Ft)
        sy = jnp.clip(dy0 * a + dy1 * c + y2, -1.0, 1.0)   # (1, Ft)
        samp_ref[t:t + 1, :] = sx
        samp_ref[TT + t:TT + t + 1, :] = sy

        # align_corners=False pixel coordinates
        pxp = (sx + 1.0) * (0.5 * float(W)) - 0.5           # (1, Ft)
        pyp = (sy + 1.0) * (0.5 * float(H)) - 0.5

        # Tent (bilinear) weights; out-of-bounds taps vanish -> zeros padding.
        wx = jnp.maximum(0.0, 1.0 - jnp.abs(pxp - cols))    # (W, Ft)
        wy = jnp.maximum(0.0, 1.0 - jnp.abs(pyp - rows))    # (H, Ft)

        # Separable contraction: W on the MXU, then H on the VPU.
        tmat = jnp.dot(img, wx, preferred_element_type=jnp.float32)  # (C*H, Ft)
        for ch in range(C):
            row = t * C + ch
            val = jnp.sum(tmat[ch * H:(ch + 1) * H, :] * wy,
                          axis=0, keepdims=True)            # (1, Ft)
            tex_ref[row:row + 1, :] = val


def fused_render_pallas(cam, fverts_p, img_flat, *, C, H, W, TT, f_tile,
                        coords0, coords1):
    bs = cam.shape[0]
    f_pad = fverts_p.shape[-1]
    n_ft = f_pad // f_tile

    kernel = functools.partial(_fused_render_kernel, H=H, W=W, C=C, TT=TT,
                               coords0=coords0, coords1=coords1)
    out_shape = (
        jax.ShapeDtypeStruct((bs, TT * C, f_pad), jnp.float32),   # texture
        jax.ShapeDtypeStruct((bs, 2 * TT, f_pad), jnp.float32),   # packed sampler
    )
    return pl.pallas_call(
        kernel,
        out_shape=out_shape,
        grid_spec=pltpu.PrefetchScalarGridSpec(
            num_scalar_prefetch=0,
            grid=(bs, n_ft),
            in_specs=[
                pl.BlockSpec(memory_space=pltpu.MemorySpace.SMEM),       # cam (B,3)
                pl.BlockSpec((None, 6, f_tile), lambda b, ft: (b, 0, ft)),
                pl.BlockSpec((None, C * H, W), lambda b, ft: (b, 0, 0)),  # resident
            ],
            out_specs=[
                pl.BlockSpec((None, TT * C, f_tile), lambda b, ft: (b, 0, ft)),
                pl.BlockSpec((None, 2 * TT, f_tile), lambda b, ft: (b, 0, ft)),
            ],
        ),
        compiler_params=pltpu.CompilerParams(
            dimension_semantics=("parallel", "arbitrary")),
    )(cam, fverts_p, img_flat)


# ----------------------------------------------------------------------------
# Module glue (create_coords, face gather/pack, reshapes) + forward
# ----------------------------------------------------------------------------
def create_coords_np(tex_size=3):
    step = 1.0 if tex_size == 1 else 1.0 / (tex_size - 1)
    ab = np.arange(0.0, 1.0 + step, step, dtype=np.float32)
    xv, yv = np.meshgrid(ab, ab, indexing="ij")
    return np.stack([xv.ravel(), yv.ravel()], axis=0)               # (2, T*T)


def base_smpl_renderer_forward(cam, vertices, uv_imgs, faces, tex_size=3,
                               f_tile=512):
    """BaseSMPLRenderer.forward(cam, vertices, uv_imgs, dynamic=True)."""
    bs = cam.shape[0]
    nf = faces.shape[0]
    T = tex_size
    TT = T * T
    _, C, H, W = uv_imgs.shape

    coords = create_coords_np(T)
    coords0 = tuple(float(v) for v in coords[0])
    coords1 = tuple(float(v) for v in coords[1])

    # points_to_faces gather (projection is pointwise -> commute gather/project)
    face_xy = vertices[:, faces, :2]                                  # (B,F,3,2)
    # Pack lane-dense: (B, 6, F) with rows [x0,x1,x2,y0,y1,y2].
    fverts = jnp.transpose(face_xy, (0, 3, 2, 1)).reshape(bs, 6, nf)

    # Pad the face axis to a lane-aligned tile multiple.
    f_tile = min(f_tile, ((nf + 127) // 128) * 128)
    f_pad = ((nf + f_tile - 1) // f_tile) * f_tile
    fverts_p = jnp.pad(fverts.astype(jnp.float32),
                       ((0, 0), (0, 0), (0, f_pad - nf)))

    img_flat = uv_imgs.reshape(bs, C * H, W).astype(jnp.float32)

    tex_flat, samp_flat = fused_render_pallas(
        cam.astype(jnp.float32), fverts_p, img_flat,
        C=C, H=H, W=W, TT=TT, f_tile=f_tile,
        coords0=coords0, coords1=coords1)

    # extract_tex reshape/permute/repeat glue (lane-dense -> torch layout).
    tex = tex_flat[:, :, :nf].reshape(bs, TT, C, nf)                 # row = t*C + c
    tex = jnp.transpose(tex, (0, 2, 3, 1))                           # (B, C, F, TT)
    tex = tex.reshape(bs, C, nf, T, T)
    tex = jnp.transpose(tex, (0, 2, 3, 4, 1))                        # (B, F, T, T, C)
    textures = jnp.broadcast_to(tex[:, :, :, :, None, :], (bs, nf, T, T, T, C))

    sx = jnp.transpose(samp_flat[:, :TT, :nf], (0, 2, 1))            # (B, F, TT)
    sy = jnp.transpose(samp_flat[:, TT:, :nf], (0, 2, 1))
    sampler = jnp.stack([sx, sy], axis=-1)                           # (B, F, TT, 2)

    # nr.lighting with ambient=1, directional=0, color (1,1,1) is identity.
    # TODO(synk): nr.look_at + nr.rasterize (`images`) are not translatable here.
    return textures, sampler


# ----------------------------------------------------------------------------
# Pure-JAX reference (mirrors the PyTorch math) for verification
# ----------------------------------------------------------------------------
def _ref_grid_sample(img, grid):
    """F.grid_sample, mode=bilinear, padding=zeros, align_corners=False."""
    B, C, H, W = img.shape

    def one(img_b, grid_b):
        x = grid_b[..., 0]
        y = grid_b[..., 1]
        ix = ((x + 1.0) * W - 1.0) / 2.0
        iy = ((y + 1.0) * H - 1.0) / 2.0
        ix0 = jnp.floor(ix)
        iy0 = jnp.floor(iy)
        wx1 = ix - ix0
        wx0 = 1.0 - wx1
        wy1 = iy - iy0
        wy0 = 1.0 - wy1

        def tap(iyk, ixk, w):
            valid = (ixk >= 0) & (ixk <= W - 1) & (iyk >= 0) & (iyk <= H - 1)
            ixc = jnp.clip(ixk, 0, W - 1).astype(jnp.int32)
            iyc = jnp.clip(iyk, 0, H - 1).astype(jnp.int32)
            v = img_b[:, iyc, ixc]                                   # (C, Hg, Wg)
            return v * (w * valid.astype(w.dtype))[None]

        return (tap(iy0, ix0, wy0 * wx0) + tap(iy0, ix0 + 1, wy0 * wx1)
                + tap(iy0 + 1, ix0, wy1 * wx0) + tap(iy0 + 1, ix0 + 1, wy1 * wx1))

    return jax.vmap(one)(img, grid)


def reference_forward(cam, vertices, uv_imgs, faces, tex_size=3):
    bs = cam.shape[0]
    nf = faces.shape[0]
    T = tex_size
    coords = jnp.asarray(create_coords_np(T))

    pts = cam[:, None, 0:1] * (vertices[:, :, :2] + cam[:, None, 1:3])   # (B,Nv,2)
    fpts = pts[:, faces, :]                                              # (B,F,3,2)
    v2 = fpts[:, :, 2]
    v0v2 = fpts[:, :, 0] - v2
    v1v2 = fpts[:, :, 1] - v2
    mat = jnp.stack([v0v2, v1v2], axis=-1)                               # (B,F,2,2)
    samples = jnp.matmul(mat, coords) + v2[:, :, :, None]                # (B,F,2,TT)
    sampler = jnp.clip(jnp.transpose(samples, (0, 1, 3, 2)), -1.0, 1.0)  # (B,F,TT,2)

    tex = _ref_grid_sample(uv_imgs, sampler)                             # (B,C,F,TT)
    tex = tex.reshape(bs, 3, nf, T, T)
    tex = jnp.transpose(tex, (0, 2, 3, 4, 1))
    textures = jnp.broadcast_to(tex[:, :, :, :, None, :], (bs, nf, T, T, T, 3))
    return textures, sampler


# ----------------------------------------------------------------------------
# Main
# ----------------------------------------------------------------------------
if __name__ == "__main__":
    key = jax.random.PRNGKey(0)
    k1, k2, k3, k4 = jax.random.split(key, 4)

    bs, nv, nf, T = 2, 32, 16, 3
    H = W = 16

    # Deterministic synthetic buffers (stand-in for smpl_faces.npy etc.)
    faces = jax.random.randint(k1, (nf, 3), 0, nv, dtype=jnp.int32)
    cam = jnp.concatenate(
        [1.0 + 0.1 * jax.random.normal(k2, (bs, 1)),
         0.2 * jax.random.normal(k2, (bs, 2))], axis=1).astype(jnp.float32)
    vertices = jax.random.normal(k3, (bs, nv, 3), dtype=jnp.float32)
    uv_imgs = jax.random.normal(k4, (bs, 3, H, W), dtype=jnp.float32)

    textures, sampler = base_smpl_renderer_forward(cam, vertices, uv_imgs, faces, T)
    textures = jax.block_until_ready(textures)
    sampler = jax.block_until_ready(sampler)

    ref_textures, ref_sampler = reference_forward(cam, vertices, uv_imgs, faces, T)

    np.testing.assert_allclose(np.asarray(sampler), np.asarray(ref_sampler),
                               rtol=1e-4, atol=1e-4)
    np.testing.assert_allclose(np.asarray(textures), np.asarray(ref_textures),
                               rtol=1e-3, atol=1e-3)
    assert textures.shape == (bs, nf, T, T, T, 3)
    assert sampler.shape == (bs, nf, T * T, 2)

    print("KERNEL_OK")
</pallas_src>

<mosaic_0001>
module attributes {stable_mosaic.version = 11 : i64} {
  func.func @_fused_render_kernel(%arg0: i32, %arg1: i32, %arg2: memref<2x3xf32, #tpu.memory_space<smem>>, %arg3: memref<1x6x128xf32, #tpu.memory_space<vmem>>, %arg4: memref<1x48x16xf32, #tpu.memory_space<vmem>>, %arg5: memref<1x27x128xf32, #tpu.memory_space<vmem>>, %arg6: memref<1x18x128xf32, #tpu.memory_space<vmem>>) attributes {dimension_semantics = [#tpu.dimension_semantics<parallel>, #tpu.dimension_semantics<arbitrary>], iteration_bounds = array<i64: 2, 1>, scalar_prefetch = 0 : i64, scratch_operands = 0 : i64, tpu.core_type = #tpu.core_type<tc>, window_params = [{transform_indices = @transform_0, window_bounds = array<i64: 2, 3>}, {transform_indices = @transform_1, window_bounds = array<i64: 1, 6, 128>}, {transform_indices = @transform_2, window_bounds = array<i64: 1, 48, 16>}, {transform_indices = @transform_3, window_bounds = array<i64: 1, 27, 128>}, {transform_indices = @transform_4, window_bounds = array<i64: 1, 18, 128>}]} {
    %0 = arith.index_cast %arg0 : i32 to index
    %c0 = arith.constant 0 : index
    %1 = memref.load %arg2[%0, %c0] : memref<2x3xf32, #tpu.memory_space<smem>>
    %2 = arith.index_cast %arg0 : i32 to index
    %c1 = arith.constant 1 : index
    %3 = memref.load %arg2[%2, %c1] : memref<2x3xf32, #tpu.memory_space<smem>>
    %4 = arith.index_cast %arg0 : i32 to index
    %c2 = arith.constant 2 : index
    %5 = memref.load %arg2[%4, %c2] : memref<2x3xf32, #tpu.memory_space<smem>>
    %c0_0 = arith.constant 0 : index
    %c0_1 = arith.constant 0 : index
    %c0_2 = arith.constant 0 : index
    %6 = vector.load %arg3[%c0_0, %c0_1, %c0_2] : memref<1x6x128xf32, #tpu.memory_space<vmem>>, vector<1x6x128xf32>
    %7 = vector.shape_cast %6 : vector<1x6x128xf32> to vector<6x128xf32>
    %c0_3 = arith.constant 0 : index
    %c0_4 = arith.constant 0 : index
    %c0_5 = arith.constant 0 : index
    %8 = vector.load %arg4[%c0_3, %c0_4, %c0_5] : memref<1x48x16xf32, #tpu.memory_space<vmem>>, vector<1x48x16xf32>
    %9 = vector.shape_cast %8 : vector<1x48x16xf32> to vector<48x16xf32>
    %10 = vector.extract_strided_slice %7 {offsets = [0, 0], sizes = [3, 128], strides = [1, 1]} : vector<6x128xf32> to vector<3x128xf32>
    %11 = vector.broadcast %3 : f32 to vector<3x128xf32>
    %12 = arith.addf %10, %11 : vector<3x128xf32>
    %13 = vector.broadcast %1 : f32 to vector<3x128xf32>
    %14 = arith.mulf %13, %12 : vector<3x128xf32>
    %15 = vector.extract_strided_slice %7 {offsets = [3, 0], sizes = [3, 128], strides = [1, 1]} : vector<6x128xf32> to vector<3x128xf32>
    %16 = vector.broadcast %5 : f32 to vector<3x128xf32>
    %17 = arith.addf %15, %16 : vector<3x128xf32>
    %18 = vector.broadcast %1 : f32 to vector<3x128xf32>
    %19 = arith.mulf %18, %17 : vector<3x128xf32>
    %20 = vector.extract_strided_slice %14 {offsets = [0, 0], sizes = [1, 128], strides = [1, 1]} : vector<3x128xf32> to vector<1x128xf32>
    %21 = vector.extract_strided_slice %14 {offsets = [2, 0], sizes = [1, 128], strides = [1, 1]} : vector<3x128xf32> to vector<1x128xf32>
    %22 = arith.subf %20, %21 : vector<1x128xf32>
    %23 = vector.extract_strided_slice %14 {offsets = [1, 0], sizes = [1, 128], strides = [1, 1]} : vector<3x128xf32> to vector<1x128xf32>
    %24 = vector.extract_strided_slice %14 {offsets = [2, 0], sizes = [1, 128], strides = [1, 1]} : vector<3x128xf32> to vector<1x128xf32>
    %25 = arith.subf %23, %24 : vector<1x128xf32>
    %26 = vector.extract_strided_slice %14 {offsets = [2, 0], sizes = [1, 128], strides = [1, 1]} : vector<3x128xf32> to vector<1x128xf32>
    %27 = vector.extract_strided_slice %19 {offsets = [0, 0], sizes = [1, 128], strides = [1, 1]} : vector<3x128xf32> to vector<1x128xf32>
    %28 = vector.extract_strided_slice %19 {offsets = [2, 0], sizes = [1, 128], strides = [1, 1]} : vector<3x128xf32> to vector<1x128xf32>
    %29 = arith.subf %27, %28 : vector<1x128xf32>
    %30 = vector.extract_strided_slice %19 {offsets = [1, 0], sizes = [1, 128], strides = [1, 1]} : vector<3x128xf32> to vector<1x128xf32>
    %31 = vector.extract_strided_slice %19 {offsets = [2, 0], sizes = [1, 128], strides = [1, 1]} : vector<3x128xf32> to vector<1x128xf32>
    %32 = arith.subf %30, %31 : vector<1x128xf32>
    %33 = vector.extract_strided_slice %19 {offsets = [2, 0], sizes = [1, 128], strides = [1, 1]} : vector<3x128xf32> to vector<1x128xf32>
    %34 = tpu.iota {dimensions = array<i32: 0>} : vector<16x128xi32>
    %35 = arith.sitofp %34 : vector<16x128xi32> to vector<16x128xf32>
    %36 = tpu.iota {dimensions = array<i32: 0>} : vector<16x128xi32>
    %37 = arith.sitofp %36 : vector<16x128xi32> to vector<16x128xf32>
    %cst = arith.constant 0.000000e+00 : f32
    %38 = vector.broadcast %cst : f32 to vector<1x128xf32>
    %39 = arith.mulf %22, %38 : vector<1x128xf32>
    %cst_6 = arith.constant 0.000000e+00 : f32
    %40 = vector.broadcast %cst_6 : f32 to vector<1x128xf32>
    %41 = arith.mulf %25, %40 : vector<1x128xf32>
    %42 = arith.addf %39, %41 : vector<1x128xf32>
    %43 = arith.addf %42, %26 : vector<1x128xf32>
    %cst_7 = arith.constant -1.000000e+00 : f32
    %cst_8 = arith.constant 1.000000e+00 : f32
    %44 = vector.broadcast %cst_7 : f32 to vector<1x128xf32>
    %45 = arith.maximumf %44, %43 : vector<1x128xf32>
    %46 = vector.broadcast %cst_8 : f32 to vector<1x128xf32>
    %47 = arith.minimumf %46, %45 : vector<1x128xf32>
    %cst_9 = arith.constant 0.000000e+00 : f32
    %48 = vector.broadcast %cst_9 : f32 to vector<1x128xf32>
    %49 = arith.mulf %29, %48 : vector<1x128xf32>
    %cst_10 = arith.constant 0.000000e+00 : f32
    %50 = vector.broadcast %cst_10 : f32 to vector<1x128xf32>
    %51 = arith.mulf %32, %50 : vector<1x128xf32>
    %52 = arith.addf %49, %51 : vector<1x128xf32>
    %53 = arith.addf %52, %33 : vector<1x128xf32>
    %cst_11 = arith.constant -1.000000e+00 : f32
    %cst_12 = arith.constant 1.000000e+00 : f32
    %54 = vector.broadcast %cst_11 : f32 to vector<1x128xf32>
    %55 = arith.maximumf %54, %53 : vector<1x128xf32>
    %56 = vector.broadcast %cst_12 : f32 to vector<1x128xf32>
    %57 = arith.minimumf %56, %55 : vector<1x128xf32>
    %c0_13 = arith.constant 0 : index
    %c0_14 = arith.constant 0 : index
    %c0_15 = arith.constant 0 : index
    %58 = vector.load %arg6[%c0_13, %c0_14, %c0_15] : memref<1x18x128xf32, #tpu.memory_space<vmem>>, vector<1x1x128xf32>
    %59 = vector.shape_cast %58 : vector<1x1x128xf32> to vector<1x128xf32>
    %60 = vector.shape_cast %47 : vector<1x128xf32> to vector<1x1x128xf32>
    tpu.vector_store %arg6[%c0_13, %c0_14, %c0_15], %60 {strides = array<i32>} : memref<1x18x128xf32, #tpu.memory_space<vmem>>, vector<1x1x128xf32>,
    %c0_16 = arith.constant 0 : index
    %c9 = arith.constant 9 : index
    %c0_17 = arith.constant 0 : index
    %61 = vector.load %arg6[%c0_16, %c9, %c0_17] : memref<1x18x128xf32, #tpu.memory_space<vmem>>, vector<1x1x128xf32>
    %62 = vector.shape_cast %61 : vector<1x1x128xf32> to vector<1x128xf32>
    %63 = vector.shape_cast %57 : vector<1x128xf32> to vector<1x1x128xf32>
    tpu.vector_store %arg6[%c0_16, %c9, %c0_17], %63 {strides = array<i32>} : memref<1x18x128xf32, #tpu.memory_space<vmem>>, vector<1x1x128xf32>,
    %cst_18 = arith.constant 1.000000e+00 : f32
    %64 = vector.broadcast %cst_18 : f32 to vector<1x128xf32>
    %65 = arith.addf %47, %64 : vector<1x128xf32>
    %cst_19 = arith.constant 8.000000e+00 : f32
    %66 = vector.broadcast %cst_19 : f32 to vector<1x128xf32>
    %67 = arith.mulf %65, %66 : vector<1x128xf32>
    %cst_20 = arith.constant 5.000000e-01 : f32
    %68 = vector.broadcast %cst_20 : f32 to vector<1x128xf32>
    %69 = arith.subf %67, %68 : vector<1x128xf32>
    %cst_21 = arith.constant 1.000000e+00 : f32
    %70 = vector.broadcast %cst_21 : f32 to vector<1x128xf32>
    %71 = arith.addf %57, %70 : vector<1x128xf32>
    %cst_22 = arith.constant 8.000000e+00 : f32
    %72 = vector.broadcast %cst_22 : f32 to vector<1x128xf32>
    %73 = arith.mulf %71, %72 : vector<1x128xf32>
    %cst_23 = arith.constant 5.000000e-01 : f32
    %74 = vector.broadcast %cst_23 : f32 to vector<1x128xf32>
    %75 = arith.subf %73, %74 : vector<1x128xf32>
    %76 = vector.broadcast %69 : vector<1x128xf32> to vector<16x128xf32>
    %77 = arith.subf %76, %37 : vector<16x128xf32>
    %78 = math.absf %77 : vector<16x128xf32>
    %cst_24 = arith.constant 1.000000e+00 : f32
    %79 = vector.broadcast %cst_24 : f32 to vector<16x128xf32>
    %80 = arith.subf %79, %78 : vector<16x128xf32>
    %cst_25 = arith.constant 0.000000e+00 : f32
    %81 = vector.broadcast %cst_25 : f32 to vector<16x128xf32>
    %82 = arith.maximumf %81, %80 : vector<16x128xf32>
    %83 = vector.broadcast %75 : vector<1x128xf32> to vector<16x128xf32>
    %84 = arith.subf %83, %35 : vector<16x128xf32>
    %85 = math.absf %84 : vector<16x128xf32>
    %cst_26 = arith.constant 1.000000e+00 : f32
    %86 = vector.broadcast %cst_26 : f32 to vector<16x128xf32>
    %87 = arith.subf %86, %85 : vector<16x128xf32>
    %cst_27 = arith.constant 0.000000e+00 : f32
    %88 = vector.broadcast %cst_27 : f32 to vector<16x128xf32>
    %89 = arith.maximumf %88, %87 : vector<16x128xf32>
    %cst_28 = arith.constant dense<0.000000e+00> : vector<48x128xf32>
    %90 = tpu.matmul %9, %82, %cst_28 {dimension_numbers = #tpu.dot_dimension_numbers<[1], [0], [0], [1], [0, 0, 1, 1], [], []>} : vector<48x16xf32>, vector<16x128xf32>, vector<48x128xf32> -> vector<48x128xf32>
    %91 = vector.extract_strided_slice %90 {offsets = [0, 0], sizes = [16, 128], strides = [1, 1]} : vector<48x128xf32> to vector<16x128xf32>
    %92 = arith.mulf %91, %89 : vector<16x128xf32>
    %cst_29 = arith.constant dense<0.000000e+00> : vector<128xf32>
    %93 = vector.multi_reduction <add>, %92, %cst_29 [0] : vector<16x128xf32> to vector<128xf32>
    %94 = vector.shape_cast %93 : vector<128xf32> to vector<1x128xf32>
    %c0_30 = arith.constant 0 : index
    %c0_31 = arith.constant 0 : index
    %c0_32 = arith.constant 0 : index
    %95 = vector.load %arg5[%c0_30, %c0_31, %c0_32] : memref<1x27x128xf32, #tpu.memory_space<vmem>>, vector<1x1x128xf32>
    %96 = vector.shape_cast %95 : vector<1x1x128xf32> to vector<1x128xf32>
    %97 = vector.shape_cast %94 : vector<1x128xf32> to vector<1x1x128xf32>
    tpu.vector_store %arg5[%c0_30, %c0_31, %c0_32], %97 {strides = array<i32>} : memref<1x27x128xf32, #tpu.memory_space<vmem>>, vector<1x1x128xf32>,
    %98 = vector.extract_strided_slice %90 {offsets = [16, 0], sizes = [16, 128], strides = [1, 1]} : vector<48x128xf32> to vector<16x128xf32>
    %99 = arith.mulf %98, %89 : vector<16x128xf32>
    %cst_33 = arith.constant dense<0.000000e+00> : vector<128xf32>
    %100 = vector.multi_reduction <add>, %99, %cst_33 [0] : vector<16x128xf32> to vector<128xf32>
    %101 = vector.shape_cast %100 : vector<128xf32> to vector<1x128xf32>
    %c0_34 = arith.constant 0 : index
    %c1_35 = arith.constant 1 : index
    %c0_36 = arith.constant 0 : index
    %102 = vector.load %arg5[%c0_34, %c1_35, %c0_36] : memref<1x27x128xf32, #tpu.memory_space<vmem>>, vector<1x1x128xf32>
    %103 = vector.shape_cast %102 : vector<1x1x128xf32> to vector<1x128xf32>
    %104 = vector.shape_cast %101 : vector<1x128xf32> to vector<1x1x128xf32>
    tpu.vector_store %arg5[%c0_34, %c1_35, %c0_36], %104 {strides = array<i32>} : memref<1x27x128xf32, #tpu.memory_space<vmem>>, vector<1x1x128xf32>,
    %105 = vector.extract_strided_slice %90 {offsets = [32, 0], sizes = [16, 128], strides = [1, 1]} : vector<48x128xf32> to vector<16x128xf32>
    %106 = arith.mulf %105, %89 : vector<16x128xf32>
    %cst_37 = arith.constant dense<0.000000e+00> : vector<128xf32>
    %107 = vector.multi_reduction <add>, %106, %cst_37 [0] : vector<16x128xf32> to vector<128xf32>
    %108 = vector.shape_cast %107 : vector<128xf32> to vector<1x128xf32>
    %c0_38 = arith.constant 0 : index
    %c2_39 = arith.constant 2 : index
    %c0_40 = arith.constant 0 : index
    %109 = vector.load %arg5[%c0_38, %c2_39, %c0_40] : memref<1x27x128xf32, #tpu.memory_space<vmem>>, vector<1x1x128xf32>
    %110 = vector.shape_cast %109 : vector<1x1x128xf32> to vector<1x128xf32>
    %111 = vector.shape_cast %108 : vector<1x128xf32> to vector<1x1x128xf32>
    tpu.vector_store %arg5[%c0_38, %c2_39, %c0_40], %111 {strides = array<i32>} : memref<1x27x128xf32, #tpu.memory_space<vmem>>, vector<1x1x128xf32>,
    %cst_41 = arith.constant 0.000000e+00 : f32
    %112 = vector.broadcast %cst_41 : f32 to vector<1x128xf32>
    %113 = arith.mulf %22, %112 : vector<1x128xf32>
    %cst_42 = arith.constant 5.000000e-01 : f32
    %114 = vector.broadcast %cst_42 : f32 to vector<1x128xf32>
    %115 = arith.mulf %25, %114 : vector<1x128xf32>
    %116 = arith.addf %113, %115 : vector<1x128xf32>
    %117 = arith.addf %116, %26 : vector<1x128xf32>
    %cst_43 = arith.constant -1.000000e+00 : f32
    %cst_44 = arith.constant 1.000000e+00 : f32
    %118 = vector.broadcast %cst_43 : f32 to vector<1x128xf32>
    %119 = arith.maximumf %118, %117 : vector<1x128xf32>
    %120 = vector.broadcast %cst_44 : f32 to vector<1x128xf32>
    %121 = arith.minimumf %120, %119 : vector<1x128xf32>
    %cst_45 = arith.constant 0.000000e+00 : f32
    %122 = vector.broadcast %cst_45 : f32 to vector<1x128xf32>
    %123 = arith.mulf %29, %122 : vector<1x128xf32>
    %cst_46 = arith.constant 5.000000e-01 : f32
    %124 = vector.broadcast %cst_46 : f32 to vector<1x128xf32>
    %125 = arith.mulf %32, %124 : vector<1x128xf32>
    %126 = arith.addf %123, %125 : vector<1x128xf32>
    %127 = arith.addf %126, %33 : vector<1x128xf32>
    %cst_47 = arith.constant -1.000000e+00 : f32
    %cst_48 = arith.constant 1.000000e+00 : f32
    %128 = vector.broadcast %cst_47 : f32 to vector<1x128xf32>
    %129 = arith.maximumf %128, %127 : vector<1x128xf32>
    %130 = vector.broadcast %cst_48 : f32 to vector<1x128xf32>
    %131 = arith.minimumf %130, %129 : vector<1x128xf32>
    %c0_49 = arith.constant 0 : index
    %c1_50 = arith.constant 1 : index
    %c0_51 = arith.constant 0 : index
    %132 = vector.load %arg6[%c0_49, %c1_50, %c0_51] : memref<1x18x128xf32, #tpu.memory_space<vmem>>, vector<1x1x128xf32>
    %133 = vector.shape_cast %132 : vector<1x1x128xf32> to vector<1x128xf32>
    %134 = vector.shape_cast %121 : vector<1x128xf32> to vector<1x1x128xf32>
    tpu.vector_store %arg6[%c0_49, %c1_50, %c0_51], %134 {strides = array<i32>} : memref<1x18x128xf32, #tpu.memory_space<vmem>>, vector<1x1x128xf32>,
    %c0_52 = arith.constant 0 : index
    %c10 = arith.constant 10 : index
    %c0_53 = arith.constant 0 : index
    %135 = vector.load %arg6[%c0_52, %c10, %c0_53] : memref<1x18x128xf32, #tpu.memory_space<vmem>>, vector<1x1x128xf32>
    %136 = vector.shape_cast %135 : vector<1x1x128xf32> to vector<1x128xf32>
    %137 = vector.shape_cast %131 : vector<1x128xf32> to vector<1x1x128xf32>
    tpu.vector_store %arg6[%c0_52, %c10, %c0_53], %137 {strides = array<i32>} : memref<1x18x128xf32, #tpu.memory_space<vmem>>, vector<1x1x128xf32>,
    %cst_54 = arith.constant 1.000000e+00 : f32
    %138 = vector.broadcast %cst_54 : f32 to vector<1x128xf32>
    %139 = arith.addf %121, %138 : vector<1x128xf32>
    %cst_55 = arith.constant 8.000000e+00 : f32
    %140 = vector.broadcast %cst_55 : f32 to vector<1x128xf32>
    %141 = arith.mulf %139, %140 : vector<1x128xf32>
    %cst_56 = arith.constant 5.000000e-01 : f32
    %142 = vector.broadcast %cst_56 : f32 to vector<1x128xf32>
    %143 = arith.subf %141, %142 : vector<1x128xf32>
    %cst_57 = arith.constant 1.000000e+00 : f32
    %144 = vector.broadcast %cst_57 : f32 to vector<1x128xf32>
    %145 = arith.addf %131, %144 : vector<1x128xf32>
    %cst_58 = arith.constant 8.000000e+00 : f32
    %146 = vector.broadcast %cst_58 : f32 to vector<1x128xf32>
    %147 = arith.mulf %145, %146 : vector<1x128xf32>
    %cst_59 = arith.constant 5.000000e-01 : f32
    %148 = vector.broadcast %cst_59 : f32 to vector<1x128xf32>
    %149 = arith.subf %147, %148 : vector<1x128xf32>
    %150 = vector.broadcast %143 : vector<1x128xf32> to vector<16x128xf32>
    %151 = arith.subf %150, %37 : vector<16x128xf32>
    %152 = math.absf %151 : vector<16x128xf32>
    %cst_60 = arith.constant 1.000000e+00 : f32
    %153 = vector.broadcast %cst_60 : f32 to vector<16x128xf32>
    %154 = arith.subf %153, %152 : vector<16x128xf32>
    %cst_61 = arith.constant 0.000000e+00 : f32
    %155 = vector.broadcast %cst_61 : f32 to vector<16x128xf32>
    %156 = arith.maximumf %155, %154 : vector<16x128xf32>
    %157 = vector.broadcast %149 : vector<1x128xf32> to vector<16x128xf32>
    %158 = arith.subf %157, %35 : vector<16x128xf32>
    %159 = math.absf %158 : vector<16x128xf32>
    %cst_62 = arith.constant 1.000000e+00 : f32
    %160 = vector.broadcast %cst_62 : f32 to vector<16x128xf32>
    %161 = arith.subf %160, %159 : vector<16x128xf32>
    %cst_63 = arith.constant 0.000000e+00 : f32
    %162 = vector.broadcast %cst_63 : f32 to vector<16x128xf32>
    %163 = arith.maximumf %162, %161 : vector<16x128xf32>
    %cst_64 = arith.constant dense<0.000000e+00> : vector<48x128xf32>
    %164 = tpu.matmul %9, %156, %cst_64 {dimension_numbers = #tpu.dot_dimension_numbers<[1], [0], [0], [1], [0, 0, 1, 1], [], []>} : vector<48x16xf32>, vector<16x128xf32>, vector<48x128xf32> -> vector<48x128xf32>
    %165 = vector.extract_strided_slice %164 {offsets = [0, 0], sizes = [16, 128], strides = [1, 1]} : vector<48x128xf32> to vector<16x128xf32>
    %166 = arith.mulf %165, %163 : vector<16x128xf32>
    %cst_65 = arith.constant dense<0.000000e+00> : vector<128xf32>
    %167 = vector.multi_reduction <add>, %166, %cst_65 [0] : vector<16x128xf32> to vector<128xf32>
    %168 = vector.shape_cast %167 : vector<128xf32> to vector<1x128xf32>
    %c0_66 = arith.constant 0 : index
    %c3 = arith.constant 3 : index
    %c0_67 = arith.constant 0 : index
    %169 = vector.load %arg5[%c0_66, %c3, %c0_67] : memref<1x27x128xf32, #tpu.memory_space<vmem>>, vector<1x1x128xf32>
    %170 = vector.shape_cast %169 : vector<1x1x128xf32> to vector<1x128xf32>
    %171 = vector.shape_cast %168 : vector<1x128xf32> to vector<1x1x128xf32>
    tpu.vector_store %arg5[%c0_66, %c3, %c0_67], %171 {strides = array<i32>} : memref<1x27x128xf32, #tpu.memory_space<vmem>>, vector<1x1x128xf32>,
    %172 = vector.extract_strided_slice %164 {offsets = [16, 0], sizes = [16, 128], strides = [1, 1]} : vector<48x128xf32> to vector<16x128xf32>
    %173 = arith.mulf %172, %163 : vector<16x128xf32>
    %cst_68 = arith.constant dense<0.000000e+00> : vector<128xf32>
    %174 = vector.multi_reduction <add>, %173, %cst_68 [0] : vector<16x128xf32> to vector<128xf32>
    %175 = vector.shape_cast %174 : vector<128xf32> to vector<1x128xf32>
    %c0_69 = arith.constant 0 : index
    %c4 = arith.constant 4 : index
    %c0_70 = arith.constant 0 : index
    %176 = vector.load %arg5[%c0_69, %c4, %c0_70] : memref<1x27x128xf32, #tpu.memory_space<vmem>>, vector<1x1x128xf32>
    %177 = vector.shape_cast %176 : vector<1x1x128xf32> to vector<1x128xf32>
    %178 = vector.shape_cast %175 : vector<1x128xf32> to vector<1x1x128xf32>
    tpu.vector_store %arg5[%c0_69, %c4, %c0_70], %178 {strides = array<i32>} : memref<1x27x128xf32, #tpu.memory_space<vmem>>, vector<1x1x128xf32>,
    %179 = vector.extract_strided_slice %164 {offsets = [32, 0], sizes = [16, 128], strides = [1, 1]} : vector<48x128xf32> to vector<16x128xf32>
    %180 = arith.mulf %179, %163 : vector<16x128xf32>
    %cst_71 = arith.constant dense<0.000000e+00> : vector<128xf32>
    %181 = vector.multi_reduction <add>, %180, %cst_71 [0] : vector<16x128xf32> to vector<128xf32>
    %182 = vector.shape_cast %181 : vector<128xf32> to vector<1x128xf32>
    %c0_72 = arith.constant 0 : index
    %c5 = arith.constant 5 : index
    %c0_73 = arith.constant 0 : index
    %183 = vector.load %arg5[%c0_72, %c5, %c0_73] : memref<1x27x128xf32, #tpu.memory_space<vmem>>, vector<1x1x128xf32>
    %184 = vector.shape_cast %183 : vector<1x1x128xf32> to vector<1x128xf32>
    %185 = vector.shape_cast %182 : vector<1x128xf32> to vector<1x1x128xf32>
    tpu.vector_store %arg5[%c0_72, %c5, %c0_73], %185 {strides = array<i32>} : memref<1x27x128xf32, #tpu.memory_space<vmem>>, vector<1x1x128xf32>,
    %cst_74 = arith.constant 0.000000e+00 : f32
    %186 = vector.broadcast %cst_74 : f32 to vector<1x128xf32>
    %187 = arith.mulf %22, %186 : vector<1x128xf32>
    %cst_75 = arith.constant 1.000000e+00 : f32
    %188 = vector.broadcast %cst_75 : f32 to vector<1x128xf32>
    %189 = arith.mulf %25, %188 : vector<1x128xf32>
    %190 = arith.addf %187, %189 : vector<1x128xf32>
    %191 = arith.addf %190, %26 : vector<1x128xf32>
    %cst_76 = arith.constant -1.000000e+00 : f32
    %cst_77 = arith.constant 1.000000e+00 : f32
    %192 = vector.broadcast %cst_76 : f32 to vector<1x128xf32>
    %193 = arith.maximumf %192, %191 : vector<1x128xf32>
    %194 = vector.broadcast %cst_77 : f32 to vector<1x128xf32>
    %195 = arith.minimumf %194, %193 : vector<1x128xf32>
    %cst_78 = arith.constant 0.000000e+00 : f32
    %196 = vector.broadcast %cst_78 : f32 to vector<1x128xf32>
    %197 = arith.mulf %29, %196 : vector<1x128xf32>
    %cst_79 = arith.constant 1.000000e+00 : f32
    %198 = vector.broadcast %cst_79 : f32 to vector<1x128xf32>
    %199 = arith.mulf %32, %198 : vector<1x128xf32>
    %200 = arith.addf %197, %199 : vector<1x128xf32>
    %201 = arith.addf %200, %33 : vector<1x128xf32>
    %cst_80 = arith.constant -1.000000e+00 : f32
    %cst_81 = arith.constant 1.000000e+00 : f32
    %202 = vector.broadcast %cst_80 : f32 to vector<1x128xf32>
    %203 = arith.maximumf %202, %201 : vector<1x128xf32>
    %204 = vector.broadcast %cst_81 : f32 to vector<1x128xf32>
    %205 = arith.minimumf %204, %203 : vector<1x128xf32>
    %c0_82 = arith.constant 0 : index
    %c2_83 = arith.constant 2 : index
    %c0_84 = arith.constant 0 : index
    %206 = vector.load %arg6[%c0_82, %c2_83, %c0_84] : memref<1x18x128xf32, #tpu.memory_space<vmem>>, vector<1x1x128xf32>
    %207 = vector.shape_cast %206 : vector<1x1x128xf32> to vector<1x128xf32>
    %208 = vector.shape_cast %195 : vector<1x128xf32> to vector<1x1x128xf32>
    tpu.vector_store %arg6[%c0_82, %c2_83, %c0_84], %208 {strides = array<i32>} : memref<1x18x128xf32, #tpu.memory_space<vmem>>, vector<1x1x128xf32>,
    %c0_85 = arith.constant 0 : index
    %c11 = arith.constant 11 : index
    %c0_86 = arith.constant 0 : index
    %209 = vector.load %arg6[%c0_85, %c11, %c0_86] : memref<1x18x128xf32, #tpu.memory_space<vmem>>, vector<1x1x128xf32>
    %210 = vector.shape_cast %209 : vector<1x1x128xf32> to vector<1x128xf32>
    %211 = vector.shape_cast %205 : vector<1x128xf32> to vector<1x1x128xf32>
    tpu.vector_store %arg6[%c0_85, %c11, %c0_86], %211 {strides = array<i32>} : memref<1x18x128xf32, #tpu.memory_space<vmem>>, vector<1x1x128xf32>,
    %cst_87 = arith.constant 1.000000e+00 : f32
    %212 = vector.broadcast %cst_87 : f32 to vector<1x128xf32>
    %213 = arith.addf %195, %212 : vector<1x128xf32>
    %cst_88 = arith.constant 8.000000e+00 : f32
    %214 = vector.broadcast %cst_88 : f32 to vector<1x128xf32>
    %215 = arith.mulf %213, %214 : vector<1x128xf32>
    %cst_89 = arith.constant 5.000000e-01 : f32
    %216 = vector.broadcast %cst_89 : f32 to vector<1x128xf32>
    %217 = arith.subf %215, %216 : vector<1x128xf32>
    %cst_90 = arith.constant 1.000000e+00 : f32
    %218 = vector.broadcast %cst_90 : f32 to vector<1x128xf32>
    %219 = arith.addf %205, %218 : vector<1x128xf32>
    %cst_91 = arith.constant 8.000000e+00 : f32
    %220 = vector.broadcast %cst_91 : f32 to vector<1x128xf32>
    %221 = arith.mulf %219, %220 : vector<1x128xf32>
    %cst_92 = arith.constant 5.000000e-01 : f32
    %222 = vector.broadcast %cst_92 : f32 to vector<1x128xf32>
    %223 = arith.subf %221, %222 : vector<1x128xf32>
    %224 = vector.broadcast %217 : vector<1x128xf32> to vector<16x128xf32>
    %225 = arith.subf %224, %37 : vector<16x128xf32>
    %226 = math.absf %225 : vector<16x128xf32>
    %cst_93 = arith.constant 1.000000e+00 : f32
    %227 = vector.broadcast %cst_93 : f32 to vector<16x128xf32>
    %228 = arith.subf %227, %226 : vector<16x128xf32>
    %cst_94 = arith.constant 0.000000e+00 : f32
    %229 = vector.broadcast %cst_94 : f32 to vector<16x128xf32>
    %230 = arith.maximumf %229, %228 : vector<16x128xf32>
    %231 = vector.broadcast %223 : vector<1x128xf32> to vector<16x128xf32>
    %232 = arith.subf %231, %35 : vector<16x128xf32>
    %233 = math.absf %232 : vector<16x128xf32>
    %cst_95 = arith.constant 1.000000e+00 : f32
    %234 = vector.broadcast %cst_95 : f32 to vector<16x128xf32>
    %235 = arith.subf %234, %233 : vector<16x128xf32>
    %cst_96 = arith.constant 0.000000e+00 : f32
    %236 = vector.broadcast %cst_96 : f32 to vector<16x128xf32>
    %237 = arith.maximumf %236, %235 : vector<16x128xf32>
    %cst_97 = arith.constant dense<0.000000e+00> : vector<48x128xf32>
    %238 = tpu.matmul %9, %230, %cst_97 {dimension_numbers = #tpu.dot_dimension_numbers<[1], [0], [0], [1], [0, 0, 1, 1], [], []>} : vector<48x16xf32>, vector<16x128xf32>, vector<48x128xf32> -> vector<48x128xf32>
    %239 = vector.extract_strided_slice %238 {offsets = [0, 0], sizes = [16, 128], strides = [1, 1]} : vector<48x128xf32> to vector<16x128xf32>
    %240 = arith.mulf %239, %237 : vector<16x128xf32>
    %cst_98 = arith.constant dense<0.000000e+00> : vector<128xf32>
    %241 = vector.multi_reduction <add>, %240, %cst_98 [0] : vector<16x128xf32> to vector<128xf32>
    %242 = vector.shape_cast %241 : vector<128xf32> to vector<1x128xf32>
    %c0_99 = arith.constant 0 : index
    %c6 = arith.constant 6 : index
    %c0_100 = arith.constant 0 : index
    %243 = vector.load %arg5[%c0_99, %c6, %c0_100] : memref<1x27x128xf32, #tpu.memory_space<vmem>>, vector<1x1x128xf32>
    %244 = vector.shape_cast %243 : vector<1x1x128xf32> to vector<1x128xf32>
    %245 = vector.shape_cast %242 : vector<1x128xf32> to vector<1x1x128xf32>
    tpu.vector_store %arg5[%c0_99, %c6, %c0_100], %245 {strides = array<i32>} : memref<1x27x128xf32, #tpu.memory_space<vmem>>, vector<1x1x128xf32>,
    %246 = vector.extract_strided_slice %238 {offsets = [16, 0], sizes = [16, 128], strides = [1, 1]} : vector<48x128xf32> to vector<16x128xf32>
    %247 = arith.mulf %246, %237 : vector<16x128xf32>
    %cst_101 = arith.constant dense<0.000000e+00> : vector<128xf32>
    %248 = vector.multi_reduction <add>, %247, %cst_101 [0] : vector<16x128xf32> to vector<128xf32>
    %249 = vector.shape_cast %248 : vector<128xf32> to vector<1x128xf32>
    %c0_102 = arith.constant 0 : index
    %c7 = arith.constant 7 : index
    %c0_103 = arith.constant 0 : index
    %250 = vector.load %arg5[%c0_102, %c7, %c0_103] : memref<1x27x128xf32, #tpu.memory_space<vmem>>, vector<1x1x128xf32>
    %251 = vector.shape_cast %250 : vector<1x1x128xf32> to vector<1x128xf32>
    %252 = vector.shape_cast %249 : vector<1x128xf32> to vector<1x1x128xf32>
    tpu.vector_store %arg5[%c0_102, %c7, %c0_103], %252 {strides = array<i32>} : memref<1x27x128xf32, #tpu.memory_space<vmem>>, vector<1x1x128xf32>,
    %253 = vector.extract_strided_slice %238 {offsets = [32, 0], sizes = [16, 128], strides = [1, 1]} : vector<48x128xf32> to vector<16x128xf32>
    %254 = arith.mulf %253, %237 : vector<16x128xf32>
    %cst_104 = arith.constant dense<0.000000e+00> : vector<128xf32>
    %255 = vector.multi_reduction <add>, %254, %cst_104 [0] : vector<16x128xf32> to vector<128xf32>
    %256 = vector.shape_cast %255 : vector<128xf32> to vector<1x128xf32>
    %c0_105 = arith.constant 0 : index
    %c8 = arith.constant 8 : index
    %c0_106 = arith.constant 0 : index
    %257 = vector.load %arg5[%c0_105, %c8, %c0_106] : memref<1x27x128xf32, #tpu.memory_space<vmem>>, vector<1x1x128xf32>
    %258 = vector.shape_cast %257 : vector<1x1x128xf32> to vector<1x128xf32>
    %259 = vector.shape_cast %256 : vector<1x128xf32> to vector<1x1x128xf32>
    tpu.vector_store %arg5[%c0_105, %c8, %c0_106], %259 {strides = array<i32>} : memref<1x27x128xf32, #tpu.memory_space<vmem>>, vector<1x1x128xf32>,
    %cst_107 = arith.constant 5.000000e-01 : f32
    %260 = vector.broadcast %cst_107 : f32 to vector<1x128xf32>
    %261 = arith.mulf %22, %260 : vector<1x128xf32>
    %cst_108 = arith.constant 0.000000e+00 : f32
    %262 = vector.broadcast %cst_108 : f32 to vector<1x128xf32>
    %263 = arith.mulf %25, %262 : vector<1x128xf32>
    %264 = arith.addf %261, %263 : vector<1x128xf32>
    %265 = arith.addf %264, %26 : vector<1x128xf32>
    %cst_109 = arith.constant -1.000000e+00 : f32
    %cst_110 = arith.constant 1.000000e+00 : f32
    %266 = vector.broadcast %cst_109 : f32 to vector<1x128xf32>
    %267 = arith.maximumf %266, %265 : vector<1x128xf32>
    %268 = vector.broadcast %cst_110 : f32 to vector<1x128xf32>
    %269 = arith.minimumf %268, %267 : vector<1x128xf32>
    %cst_111 = arith.constant 5.000000e-01 : f32
    %270 = vector.broadcast %cst_111 : f32 to vector<1x128xf32>
    %271 = arith.mulf %29, %270 : vector<1x128xf32>
    %cst_112 = arith.constant 0.000000e+00 : f32
    %272 = vector.broadcast %cst_112 : f32 to vector<1x128xf32>
    %273 = arith.mulf %32, %272 : vector<1x128xf32>
    %274 = arith.addf %271, %273 : vector<1x128xf32>
    %275 = arith.addf %274, %33 : vector<1x128xf32>
    %cst_113 = arith.constant -1.000000e+00 : f32
    %cst_114 = arith.constant 1.000000e+00 : f32
    %276 = vector.broadcast %cst_113 : f32 to vector<1x128xf32>
    %277 = arith.maximumf %276, %275 : vector<1x128xf32>
    %278 = vector.broadcast %cst_114 : f32 to vector<1x128xf32>
    %279 = arith.minimumf %278, %277 : vector<1x128xf32>
    %c0_115 = arith.constant 0 : index
    %c3_116 = arith.constant 3 : index
    %c0_117 = arith.constant 0 : index
    %280 = vector.load %arg6[%c0_115, %c3_116, %c0_117] : memref<1x18x128xf32, #tpu.memory_space<vmem>>, vector<1x1x128xf32>
    %281 = vector.shape_cast %280 : vector<1x1x128xf32> to vector<1x128xf32>
    %282 = vector.shape_cast %269 : vector<1x128xf32> to vector<1x1x128xf32>
    tpu.vector_store %arg6[%c0_115, %c3_116, %c0_117], %282 {strides = array<i32>} : memref<1x18x128xf32, #tpu.memory_space<vmem>>, vector<1x1x128xf32>,
    %c0_118 = arith.constant 0 : index
    %c12 = arith.constant 12 : index
    %c0_119 = arith.constant 0 : index
    %283 = vector.load %arg6[%c0_118, %c12, %c0_119] : memref<1x18x128xf32, #tpu.memory_space<vmem>>, vector<1x1x128xf32>
    %284 = vector.shape_cast %283 : vector<1x1x128xf32> to vector<1x128xf32>
    %285 = vector.shape_cast %279 : vector<1x128xf32> to vector<1x1x128xf32>
    tpu.vector_store %arg6[%c0_118, %c12, %c0_119], %285 {strides = array<i32>} : memref<1x18x128xf32, #tpu.memory_space<vmem>>, vector<1x1x128xf32>,
    %cst_120 = arith.constant 1.000000e+00 : f32
    %286 = vector.broadcast %cst_120 : f32 to vector<1x128xf32>
    %287 = arith.addf %269, %286 : vector<1x128xf32>
    %cst_121 = arith.constant 8.000000e+00 : f32
    %288 = vector.broadcast %cst_121 : f32 to vector<1x128xf32>
    %289 = arith.mulf %287, %288 : vector<1x128xf32>
    %cst_122 = arith.constant 5.000000e-01 : f32
    %290 = vector.broadcast %cst_122 : f32 to vector<1x128xf32>
    %291 = arith.subf %289, %290 : vector<1x128xf32>
    %cst_123 = arith.constant 1.000000e+00 : f32
    %292 = vector.broadcast %cst_123 : f32 to vector<1x128xf32>
    %293 = arith.addf %279, %292 : vector<1x128xf32>
    %cst_124 = arith.constant 8.000000e+00 : f32
    %294 = vector.broadcast %cst_124 : f32 to vector<1x128xf32>
    %295 = arith.mulf %293, %294 : vector<1x128xf32>
    %cst_125 = arith.constant 5.000000e-01 : f32
    %296 = vector.broadcast %cst_125 : f32 to vector<1x128xf32>
    %297 = arith.subf %295, %296 : vector<1x128xf32>
    %298 = vector.broadcast %291 : vector<1x128xf32> to vector<16x128xf32>
    %299 = arith.subf %298, %37 : vector<16x128xf32>
    %300 = math.absf %299 : vector<16x128xf32>
    %cst_126 = arith.constant 1.000000e+00 : f32
    %301 = vector.broadcast %cst_126 : f32 to vector<16x128xf32>
    %302 = arith.subf %301, %300 : vector<16x128xf32>
    %cst_127 = arith.constant 0.000000e+00 : f32
    %303 = vector.broadcast %cst_127 : f32 to vector<16x128xf32>
    %304 = arith.maximumf %303, %302 : vector<16x128xf32>
    %305 = vector.broadcast %297 : vector<1x128xf32> to vector<16x128xf32>
    %306 = arith.subf %305, %35 : vector<16x128xf32>
    %307 = math.absf %306 : vector<16x128xf32>
    %cst_128 = arith.constant 1.000000e+00 : f32
    %308 = vector.broadcast %cst_128 : f32 to vector<16x128xf32>
    %309 = arith.subf %308, %307 : vector<16x128xf32>
    %cst_129 = arith.constant 0.000000e+00 : f32
    %310 = vector.broadcast %cst_129 : f32 to vector<16x128xf32>
    %311 = arith.maximumf %310, %309 : vector<16x128xf32>
    %cst_130 = arith.constant dense<0.000000e+00> : vector<48x128xf32>
    %312 = tpu.matmul %9, %304, %cst_130 {dimension_numbers = #tpu.dot_dimension_numbers<[1], [0], [0], [1], [0, 0, 1, 1], [], []>} : vector<48x16xf32>, vector<16x128xf32>, vector<48x128xf32> -> vector<48x128xf32>
    %313 = vector.extract_strided_slice %312 {offsets = [0, 0], sizes = [16, 128], strides = [1, 1]} : vector<48x128xf32> to vector<16x128xf32>
    %314 = arith.mulf %313, %311 : vector<16x128xf32>
    %cst_131 = arith.constant dense<0.000000e+00> : vector<128xf32>
    %315 = vector.multi_reduction <add>, %314, %cst_131 [0] : vector<16x128xf32> to vector<128xf32>
    %316 = vector.shape_cast %315 : vector<128xf32> to vector<1x128xf32>
    %c0_132 = arith.constant 0 : index
    %c9_133 = arith.constant 9 : index
    %c0_134 = arith.constant 0 : index
    %317 = vector.load %arg5[%c0_132, %c9_133, %c0_134] : memref<1x27x128xf32, #tpu.memory_space<vmem>>, vector<1x1x128xf32>
    %318 = vector.shape_cast %317 : vector<1x1x128xf32> to vector<1x128xf32>
    %319 = vector.shape_cast %316 : vector<1x128xf32> to vector<1x1x128xf32>
    tpu.vector_store %arg5[%c0_132, %c9_133, %c0_134], %319 {strides = array<i32>} : memref<1x27x128xf32, #tpu.memory_space<vmem>>, vector<1x1x128xf32>,
    %320 = vector.extract_strided_slice %312 {offsets = [16, 0], sizes = [16, 128], strides = [1, 1]} : vector<48x128xf32> to vector<16x128xf32>
    %321 = arith.mulf %320, %311 : vector<16x128xf32>
    %cst_135 = arith.constant dense<0.000000e+00> : vector<128xf32>
    %322 = vector.multi_reduction <add>, %321, %cst_135 [0] : vector<16x128xf32> to vector<128xf32>
    %323 = vector.shape_cast %322 : vector<128xf32> to vector<1x128xf32>
    %c0_136 = arith.constant 0 : index
    %c10_137 = arith.constant 10 : index
    %c0_138 = arith.constant 0 : index
    %324 = vector.load %arg5[%c0_136, %c10_137, %c0_138] : memref<1x27x128xf32, #tpu.memory_space<vmem>>, vector<1x1x128xf32>
    %325 = vector.shape_cast %324 : vector<1x1x128xf32> to vector<1x128xf32>
    %326 = vector.shape_cast %323 : vector<1x128xf32> to vector<1x1x128xf32>
    tpu.vector_store %arg5[%c0_136, %c10_137, %c0_138], %326 {strides = array<i32>} : memref<1x27x128xf32, #tpu.memory_space<vmem>>, vector<1x1x128xf32>,
    %327 = vector.extract_strided_slice %312 {offsets = [32, 0], sizes = [16, 128], strides = [1, 1]} : vector<48x128xf32> to vector<16x128xf32>
    %328 = arith.mulf %327, %311 : vector<16x128xf32>
    %cst_139 = arith.constant dense<0.000000e+00> : vector<128xf32>
    %329 = vector.multi_reduction <add>, %328, %cst_139 [0] : vector<16x128xf32> to vector<128xf32>
    %330 = vector.shape_cast %329 : vector<128xf32> to vector<1x128xf32>
    %c0_140 = arith.constant 0 : index
    %c11_141 = arith.constant 11 : index
    %c0_142 = arith.constant 0 : index
    %331 = vector.load %arg5[%c0_140, %c11_141, %c0_142] : memref<1x27x128xf32, #tpu.memory_space<vmem>>, vector<1x1x128xf32>
    %332 = vector.shape_cast %331 : vector<1x1x128xf32> to vector<1x128xf32>
    %333 = vector.shape_cast %330 : vector<1x128xf32> to vector<1x1x128xf32>
    tpu.vector_store %arg5[%c0_140, %c11_141, %c0_142], %333 {strides = array<i32>} : memref<1x27x128xf32, #tpu.memory_space<vmem>>, vector<1x1x128xf32>,
    %cst_143 = arith.constant 5.000000e-01 : f32
    %334 = vector.broadcast %cst_143 : f32 to vector<1x128xf32>
    %335 = arith.mulf %22, %334 : vector<1x128xf32>
    %cst_144 = arith.constant 5.000000e-01 : f32
    %336 = vector.broadcast %cst_144 : f32 to vector<1x128xf32>
    %337 = arith.mulf %25, %336 : vector<1x128xf32>
    %338 = arith.addf %335, %337 : vector<1x128xf32>
    %339 = arith.addf %338, %26 : vector<1x128xf32>
    %cst_145 = arith.constant -1.000000e+00 : f32
    %cst_146 = arith.constant 1.000000e+00 : f32
    %340 = vector.broadcast %cst_145 : f32 to vector<1x128xf32>
    %341 = arith.maximumf %340, %339 : vector<1x128xf32>
    %342 = vector.broadcast %cst_146 : f32 to vector<1x128xf32>
    %343 = arith.minimumf %342, %341 : vector<1x128xf32>
    %cst_147 = arith.constant 5.000000e-01 : f32
    %344 = vector.broadcast %cst_147 : f32 to vector<1x128xf32>
    %345 = arith.mulf %29, %344 : vector<1x128xf32>
    %cst_148 = arith.constant 5.000000e-01 : f32
    %346 = vector.broadcast %cst_148 : f32 to vector<1x128xf32>
    %347 = arith.mulf %32, %346 : vector<1x128xf32>
    %348 = arith.addf %345, %347 : vector<1x128xf32>
    %349 = arith.addf %348, %33 : vector<1x128xf32>
    %cst_149 = arith.constant -1.000000e+00 : f32
    %cst_150 = arith.constant 1.000000e+00 : f32
    %350 = vector.broadcast %cst_149 : f32 to vector<1x128xf32>
    %351 = arith.maximumf %350, %349 : vector<1x128xf32>
    %352 = vector.broadcast %cst_150 : f32 to vector<1x128xf32>
    %353 = arith.minimumf %352, %351 : vector<1x128xf32>
    %c0_151 = arith.constant 0 : index
    %c4_152 = arith.constant 4 : index
    %c0_153 = arith.constant 0 : index
    %354 = vector.load %arg6[%c0_151, %c4_152, %c0_153] : memref<1x18x128xf32, #tpu.memory_space<vmem>>, vector<1x1x128xf32>
    %355 = vector.shape_cast %354 : vector<1x1x128xf32> to vector<1x128xf32>
    %356 = vector.shape_cast %343 : vector<1x128xf32> to vector<1x1x128xf32>
    tpu.vector_store %arg6[%c0_151, %c4_152, %c0_153], %356 {strides = array<i32>} : memref<1x18x128xf32, #tpu.memory_space<vmem>>, vector<1x1x128xf32>,
    %c0_154 = arith.constant 0 : index
    %c13 = arith.constant 13 : index
    %c0_155 = arith.constant 0 : index
    %357 = vector.load %arg6[%c0_154, %c13, %c0_155] : memref<1x18x128xf32, #tpu.memory_space<vmem>>, vector<1x1x128xf32>
    %358 = vector.shape_cast %357 : vector<1x1x128xf32> to vector<1x128xf32>
    %359 = vector.shape_cast %353 : vector<1x128xf32> to vector<1x1x128xf32>
    tpu.vector_store %arg6[%c0_154, %c13, %c0_155], %359 {strides = array<i32>} : memref<1x18x128xf32, #tpu.memory_space<vmem>>, vector<1x1x128xf32>,
    %cst_156 = arith.constant 1.000000e+00 : f32
    %360 = vector.broadcast %cst_156 : f32 to vector<1x128xf32>
    %361 = arith.addf %343, %360 : vector<1x128xf32>
    %cst_157 = arith.constant 8.000000e+00 : f32
    %362 = vector.broadcast %cst_157 : f32 to vector<1x128xf32>
    %363 = arith.mulf %361, %362 : vector<1x128xf32>
    %cst_158 = arith.constant 5.000000e-01 : f32
    %364 = vector.broadcast %cst_158 : f32 to vector<1x128xf32>
    %365 = arith.subf %363, %364 : vector<1x128xf32>
    %cst_159 = arith.constant 1.000000e+00 : f32
    %366 = vector.broadcast %cst_159 : f32 to vector<1x128xf32>
    %367 = arith.addf %353, %366 : vector<1x128xf32>
    %cst_160 = arith.constant 8.000000e+00 : f32
    %368 = vector.broadcast %cst_160 : f32 to vector<1x128xf32>
    %369 = arith.mulf %367, %368 : vector<1x128xf32>
    %cst_161 = arith.constant 5.000000e-01 : f32
    %370 = vector.broadcast %cst_161 : f32 to vector<1x128xf32>
    %371 = arith.subf %369, %370 : vector<1x128xf32>
    %372 = vector.broadcast %365 : vector<1x128xf32> to vector<16x128xf32>
    %373 = arith.subf %372, %37 : vector<16x128xf32>
    %374 = math.absf %373 : vector<16x128xf32>
    %cst_162 = arith.constant 1.000000e+00 : f32
    %375 = vector.broadcast %cst_162 : f32 to vector<16x128xf32>
    %376 = arith.subf %375, %374 : vector<16x128xf32>
    %cst_163 = arith.constant 0.000000e+00 : f32
    %377 = vector.broadcast %cst_163 : f32 to vector<16x128xf32>
    %378 = arith.maximumf %377, %376 : vector<16x128xf32>
    %379 = vector.broadcast %371 : vector<1x128xf32> to vector<16x128xf32>
    %380 = arith.subf %379, %35 : vector<16x128xf32>
    %381 = math.absf %380 : vector<16x128xf32>
    %cst_164 = arith.constant 1.000000e+00 : f32
    %382 = vector.broadcast %cst_164 : f32 to vector<16x128xf32>
    %383 = arith.subf %382, %381 : vector<16x128xf32>
    %cst_165 = arith.constant 0.000000e+00 : f32
    %384 = vector.broadcast %cst_165 : f32 to vector<16x128xf32>
    %385 = arith.maximumf %384, %383 : vector<16x128xf32>
    %cst_166 = arith.constant dense<0.000000e+00> : vector<48x128xf32>
    %386 = tpu.matmul %9, %378, %cst_166 {dimension_numbers = #tpu.dot_dimension_numbers<[1], [0], [0], [1], [0, 0, 1, 1], [], []>} : vector<48x16xf32>, vector<16x128xf32>, vector<48x128xf32> -> vector<48x128xf32>
    %387 = vector.extract_strided_slice %386 {offsets = [0, 0], sizes = [16, 128], strides = [1, 1]} : vector<48x128xf32> to vector<16x128xf32>
    %388 = arith.mulf %387, %385 : vector<16x128xf32>
    %cst_167 = arith.constant dense<0.000000e+00> : vector<128xf32>
    %389 = vector.multi_reduction <add>, %388, %cst_167 [0] : vector<16x128xf32> to vector<128xf32>
    %390 = vector.shape_cast %389 : vector<128xf32> to vector<1x128xf32>
    %c0_168 = arith.constant 0 : index
    %c12_169 = arith.constant 12 : index
    %c0_170 = arith.constant 0 : index
    %391 = vector.load %arg5[%c0_168, %c12_169, %c0_170] : memref<1x27x128xf32, #tpu.memory_space<vmem>>, vector<1x1x128xf32>
    %392 = vector.shape_cast %391 : vector<1x1x128xf32> to vector<1x128xf32>
    %393 = vector.shape_cast %390 : vector<1x128xf32> to vector<1x1x128xf32>
    tpu.vector_store %arg5[%c0_168, %c12_169, %c0_170], %393 {strides = array<i32>} : memref<1x27x128xf32, #tpu.memory_space<vmem>>, vector<1x1x128xf32>,
    %394 = vector.extract_strided_slice %386 {offsets = [16, 0], sizes = [16, 128], strides = [1, 1]} : vector<48x128xf32> to vector<16x128xf32>
    %395 = arith.mulf %394, %385 : vector<16x128xf32>
    %cst_171 = arith.constant dense<0.000000e+00> : vector<128xf32>
    %396 = vector.multi_reduction <add>, %395, %cst_171 [0] : vector<16x128xf32> to vector<128xf32>
    %397 = vector.shape_cast %396 : vector<128xf32> to vector<1x128xf32>
    %c0_172 = arith.constant 0 : index
    %c13_173 = arith.constant 13 : index
    %c0_174 = arith.constant 0 : index
    %398 = vector.load %arg5[%c0_172, %c13_173, %c0_174] : memref<1x27x128xf32, #tpu.memory_space<vmem>>, vector<1x1x128xf32>
    %399 = vector.shape_cast %398 : vector<1x1x128xf32> to vector<1x128xf32>
    %400 = vector.shape_cast %397 : vector<1x128xf32> to vector<1x1x128xf32>
    tpu.vector_store %arg5[%c0_172, %c13_173, %c0_174], %400 {strides = array<i32>} : memref<1x27x128xf32, #tpu.memory_space<vmem>>, vector<1x1x128xf32>,
    %401 = vector.extract_strided_slice %386 {offsets = [32, 0], sizes = [16, 128], strides = [1, 1]} : vector<48x128xf32> to vector<16x128xf32>
    %402 = arith.mulf %401, %385 : vector<16x128xf32>
    %cst_175 = arith.constant dense<0.000000e+00> : vector<128xf32>
    %403 = vector.multi_reduction <add>, %402, %cst_175 [0] : vector<16x128xf32> to vector<128xf32>
    %404 = vector.shape_cast %403 : vector<128xf32> to vector<1x128xf32>
    %c0_176 = arith.constant 0 : index
    %c14 = arith.constant 14 : index
    %c0_177 = arith.constant 0 : index
    %405 = vector.load %arg5[%c0_176, %c14, %c0_177] : memref<1x27x128xf32, #tpu.memory_space<vmem>>, vector<1x1x128xf32>
    %406 = vector.shape_cast %405 : vector<1x1x128xf32> to vector<1x128xf32>
    %407 = vector.shape_cast %404 : vector<1x128xf32> to vector<1x1x128xf32>
    tpu.vector_store %arg5[%c0_176, %c14, %c0_177], %407 {strides = array<i32>} : memref<1x27x128xf32, #tpu.memory_space<vmem>>, vector<1x1x128xf32>,
    %cst_178 = arith.constant 5.000000e-01 : f32
    %408 = vector.broadcast %cst_178 : f32 to vector<1x128xf32>
    %409 = arith.mulf %22, %408 : vector<1x128xf32>
    %cst_179 = arith.constant 1.000000e+00 : f32
    %410 = vector.broadcast %cst_179 : f32 to vector<1x128xf32>
    %411 = arith.mulf %25, %410 : vector<1x128xf32>
    %412 = arith.addf %409, %411 : vector<1x128xf32>
    %413 = arith.addf %412, %26 : vector<1x128xf32>
    %cst_180 = arith.constant -1.000000e+00 : f32
    %cst_181 = arith.constant 1.000000e+00 : f32
    %414 = vector.broadcast %cst_180 : f32 to vector<1x128xf32>
    %415 = arith.maximumf %414, %413 : vector<1x128xf32>
    %416 = vector.broadcast %cst_181 : f32 to vector<1x128xf32>
    %417 = arith.minimumf %416, %415 : vector<1x128xf32>
    %cst_182 = arith.constant 5.000000e-01 : f32
    %418 = vector.broadcast %cst_182 : f32 to vector<1x128xf32>
    %419 = arith.mulf %29, %418 : vector<1x128xf32>
    %cst_183 = arith.constant 1.000000e+00 : f32
    %420 = vector.broadcast %cst_183 : f32 to vector<1x128xf32>
    %421 = arith.mulf %32, %420 : vector<1x128xf32>
    %422 = arith.addf %419, %421 : vector<1x128xf32>
    %423 = arith.addf %422, %33 : vector<1x128xf32>
    %cst_184 = arith.constant -1.000000e+00 : f32
    %cst_185 = arith.constant 1.000000e+00 : f32
    %424 = vector.broadcast %cst_184 : f32 to vector<1x128xf32>
    %425 = arith.maximumf %424, %423 : vector<1x128xf32>
    %426 = vector.broadcast %cst_185 : f32 to vector<1x128xf32>
    %427 = arith.minimumf %426, %425 : vector<1x128xf32>
    %c0_186 = arith.constant 0 : index
    %c5_187 = arith.constant 5 : index
    %c0_188 = arith.constant 0 : index
    %428 = vector.load %arg6[%c0_186, %c5_187, %c0_188] : memref<1x18x128xf32, #tpu.memory_space<vmem>>, vector<1x1x128xf32>
    %429 = vector.shape_cast %428 : vector<1x1x128xf32> to vector<1x128xf32>
    %430 = vector.shape_cast %417 : vector<1x128xf32> to vector<1x1x128xf32>
    tpu.vector_store %arg6[%c0_186, %c5_187, %c0_188], %430 {strides = array<i32>} : memref<1x18x128xf32, #tpu.memory_space<vmem>>, vector<1x1x128xf32>,
    %c0_189 = arith.constant 0 : index
    %c14_190 = arith.constant 14 : index
    %c0_191 = arith.constant 0 : index
    %431 = vector.load %arg6[%c0_189, %c14_190, %c0_191] : memref<1x18x128xf32, #tpu.memory_space<vmem>>, vector<1x1x128xf32>
    %432 = vector.shape_cast %431 : vector<1x1x128xf32> to vector<1x128xf32>
    %433 = vector.shape_cast %427 : vector<1x128xf32> to vector<1x1x128xf32>
    tpu.vector_store %arg6[%c0_189, %c14_190, %c0_191], %433 {strides = array<i32>} : memref<1x18x128xf32, #tpu.memory_space<vmem>>, vector<1x1x128xf32>,
    %cst_192 = arith.constant 1.000000e+00 : f32
    %434 = vector.broadcast %cst_192 : f32 to vector<1x128xf32>
    %435 = arith.addf %417, %434 : vector<1x128xf32>
    %cst_193 = arith.constant 8.000000e+00 : f32
    %436 = vector.broadcast %cst_193 : f32 to vector<1x128xf32>
    %437 = arith.mulf %435, %436 : vector<1x128xf32>
    %cst_194 = arith.constant 5.000000e-01 : f32
    %438 = vector.broadcast %cst_194 : f32 to vector<1x128xf32>
    %439 = arith.subf %437, %438 : vector<1x128xf32>
    %cst_195 = arith.constant 1.000000e+00 : f32
    %440 = vector.broadcast %cst_195 : f32 to vector<1x128xf32>
    %441 = arith.addf %427, %440 : vector<1x128xf32>
    %cst_196 = arith.constant 8.000000e+00 : f32
    %442 = vector.broadcast %cst_196 : f32 to vector<1x128xf32>
    %443 = arith.mulf %441, %442 : vector<1x128xf32>
    %cst_197 = arith.constant 5.000000e-01 : f32
    %444 = vector.broadcast %cst_197 : f32 to vector<1x128xf32>
    %445 = arith.subf %443, %444 : vector<1x128xf32>
    %446 = vector.broadcast %439 : vector<1x128xf32> to vector<16x128xf32>
    %447 = arith.subf %446, %37 : vector<16x128xf32>
    %448 = math.absf %447 : vector<16x128xf32>
    %cst_198 = arith.constant 1.000000e+00 : f32
    %449 = vector.broadcast %cst_198 : f32 to vector<16x128xf32>
    %450 = arith.subf %449, %448 : vector<16x128xf32>
    %cst_199 = arith.constant 0.000000e+00 : f32
    %451 = vector.broadcast %cst_199 : f32 to vector<16x128xf32>
    %452 = arith.maximumf %451, %450 : vector<16x128xf32>
    %453 = vector.broadcast %445 : vector<1x128xf32> to vector<16x128xf32>
    %454 = arith.subf %453, %35 : vector<16x128xf32>
    %455 = math.absf %454 : vector<16x128xf32>
    %cst_200 = arith.constant 1.000000e+00 : f32
    %456 = vector.broadcast %cst_200 : f32 to vector<16x128xf32>
    %457 = arith.subf %456, %455 : vector<16x128xf32>
    %cst_201 = arith.constant 0.000000e+00 : f32
    %458 = vector.broadcast %cst_201 : f32 to vector<16x128xf32>
    %459 = arith.maximumf %458, %457 : vector<16x128xf32>
    %cst_202 = arith.constant dense<0.000000e+00> : vector<48x128xf32>
    %460 = tpu.matmul %9, %452, %cst_202 {dimension_numbers = #tpu.dot_dimension_numbers<[1], [0], [0], [1], [0, 0, 1, 1], [], []>} : vector<48x16xf32>, vector<16x128xf32>, vector<48x128xf32> -> vector<48x128xf32>
    %461 = vector.extract_strided_slice %460 {offsets = [0, 0], sizes = [16, 128], strides = [1, 1]} : vector<48x128xf32> to vector<16x128xf32>
    %462 = arith.mulf %461, %459 : vector<16x128xf32>
    %cst_203 = arith.constant dense<0.000000e+00> : vector<128xf32>
    %463 = vector.multi_reduction <add>, %462, %cst_203 [0] : vector<16x128xf32> to vector<128xf32>
    %464 = vector.shape_cast %463 : vector<128xf32> to vector<1x128xf32>
    %c0_204 = arith.constant 0 : index
    %c15 = arith.constant 15 : index
    %c0_205 = arith.constant 0 : index
    %465 = vector.load %arg5[%c0_204, %c15, %c0_205] : memref<1x27x128xf32, #tpu.memory_space<vmem>>, vector<1x1x128xf32>
    %466 = vector.shape_cast %465 : vector<1x1x128xf32> to vector<1x128xf32>
    %467 = vector.shape_cast %464 : vector<1x128xf32> to vector<1x1x128xf32>
    tpu.vector_store %arg5[%c0_204, %c15, %c0_205], %467 {strides = array<i32>} : memref<1x27x128xf32, #tpu.memory_space<vmem>>, vector<1x1x128xf32>,
    %468 = vector.extract_strided_slice %460 {offsets = [16, 0], sizes = [16, 128], strides = [1, 1]} : vector<48x128xf32> to vector<16x128xf32>
    %469 = arith.mulf %468, %459 : vector<16x128xf32>
    %cst_206 = arith.constant dense<0.000000e+00> : vector<128xf32>
    %470 = vector.multi_reduction <add>, %469, %cst_206 [0] : vector<16x128xf32> to vector<128xf32>
    %471 = vector.shape_cast %470 : vector<128xf32> to vector<1x128xf32>
    %c0_207 = arith.constant 0 : index
    %c16 = arith.constant 16 : index
    %c0_208 = arith.constant 0 : index
    %472 = vector.load %arg5[%c0_207, %c16, %c0_208] : memref<1x27x128xf32, #tpu.memory_space<vmem>>, vector<1x1x128xf32>
    %473 = vector.shape_cast %472 : vector<1x1x128xf32> to vector<1x128xf32>
    %474 = vector.shape_cast %471 : vector<1x128xf32> to vector<1x1x128xf32>
    tpu.vector_store %arg5[%c0_207, %c16, %c0_208], %474 {strides = array<i32>} : memref<1x27x128xf32, #tpu.memory_space<vmem>>, vector<1x1x128xf32>,
    %475 = vector.extract_strided_slice %460 {offsets = [32, 0], sizes = [16, 128], strides = [1, 1]} : vector<48x128xf32> to vector<16x128xf32>
    %476 = arith.mulf %475, %459 : vector<16x128xf32>
    %cst_209 = arith.constant dense<0.000000e+00> : vector<128xf32>
    %477 = vector.multi_reduction <add>, %476, %cst_209 [0] : vector<16x128xf32> to vector<128xf32>
    %478 = vector.shape_cast %477 : vector<128xf32> to vector<1x128xf32>
    %c0_210 = arith.constant 0 : index
    %c17 = arith.constant 17 : index
    %c0_211 = arith.constant 0 : index
    %479 = vector.load %arg5[%c0_210, %c17, %c0_211] : memref<1x27x128xf32, #tpu.memory_space<vmem>>, vector<1x1x128xf32>
    %480 = vector.shape_cast %479 : vector<1x1x128xf32> to vector<1x128xf32>
    %481 = vector.shape_cast %478 : vector<1x128xf32> to vector<1x1x128xf32>
    tpu.vector_store %arg5[%c0_210, %c17, %c0_211], %481 {strides = array<i32>} : memref<1x27x128xf32, #tpu.memory_space<vmem>>, vector<1x1x128xf32>,
    %cst_212 = arith.constant 1.000000e+00 : f32
    %482 = vector.broadcast %cst_212 : f32 to vector<1x128xf32>
    %483 = arith.mulf %22, %482 : vector<1x128xf32>
    %cst_213 = arith.constant 0.000000e+00 : f32
    %484 = vector.broadcast %cst_213 : f32 to vector<1x128xf32>
    %485 = arith.mulf %25, %484 : vector<1x128xf32>
    %486 = arith.addf %483, %485 : vector<1x128xf32>
    %487 = arith.addf %486, %26 : vector<1x128xf32>
    %cst_214 = arith.constant -1.000000e+00 : f32
    %cst_215 = arith.constant 1.000000e+00 : f32
    %488 = vector.broadcast %cst_214 : f32 to vector<1x128xf32>
    %489 = arith.maximumf %488, %487 : vector<1x128xf32>
    %490 = vector.broadcast %cst_215 : f32 to vector<1x128xf32>
    %491 = arith.minimumf %490, %489 : vector<1x128xf32>
    %cst_216 = arith.constant 1.000000e+00 : f32
    %492 = vector.broadcast %cst_216 : f32 to vector<1x128xf32>
    %493 = arith.mulf %29, %492 : vector<1x128xf32>
    %cst_217 = arith.constant 0.000000e+00 : f32
    %494 = vector.broadcast %cst_217 : f32 to vector<1x128xf32>
    %495 = arith.mulf %32, %494 : vector<1x128xf32>
    %496 = arith.addf %493, %495 : vector<1x128xf32>
    %497 = arith.addf %496, %33 : vector<1x128xf32>
    %cst_218 = arith.constant -1.000000e+00 : f32
    %cst_219 = arith.constant 1.000000e+00 : f32
    %498 = vector.broadcast %cst_218 : f32 to vector<1x128xf32>
    %499 = arith.maximumf %498, %497 : vector<1x128xf32>
    %500 = vector.broadcast %cst_219 : f32 to vector<1x128xf32>
    %501 = arith.minimumf %500, %499 : vector<1x128xf32>
    %c0_220 = arith.constant 0 : index
    %c6_221 = arith.constant 6 : index
    %c0_222 = arith.constant 0 : index
    %502 = vector.load %arg6[%c0_220, %c6_221, %c0_222] : memref<1x18x128xf32, #tpu.memory_space<vmem>>, vector<1x1x128xf32>
    %503 = vector.shape_cast %502 : vector<1x1x128xf32> to vector<1x128xf32>
    %504 = vector.shape_cast %491 : vector<1x128xf32> to vector<1x1x128xf32>
    tpu.vector_store %arg6[%c0_220, %c6_221, %c0_222], %504 {strides = array<i32>} : memref<1x18x128xf32, #tpu.memory_space<vmem>>, vector<1x1x128xf32>,
    %c0_223 = arith.constant 0 : index
    %c15_224 = arith.constant 15 : index
    %c0_225 = arith.constant 0 : index
    %505 = vector.load %arg6[%c0_223, %c15_224, %c0_225] : memref<1x18x128xf32, #tpu.memory_space<vmem>>, vector<1x1x128xf32>
    %506 = vector.shape_cast %505 : vector<1x1x128xf32> to vector<1x128xf32>
    %507 = vector.shape_cast %501 : vector<1x128xf32> to vector<1x1x128xf32>
    tpu.vector_store %arg6[%c0_223, %c15_224, %c0_225], %507 {strides = array<i32>} : memref<1x18x128xf32, #tpu.memory_space<vmem>>, vector<1x1x128xf32>,
    %cst_226 = arith.constant 1.000000e+00 : f32
    %508 = vector.broadcast %cst_226 : f32 to vector<1x128xf32>
    %509 = arith.addf %491, %508 : vector<1x128xf32>
    %cst_227 = arith.constant 8.000000e+00 : f32
    %510 = vector.broadcast %cst_227 : f32 to vector<1x128xf32>
    %511 = arith.mulf %509, %510 : vector<1x128xf32>
    %cst_228 = arith.constant 5.000000e-01 : f32
    %512 = vector.broadcast %cst_228 : f32 to vector<1x128xf32>
    %513 = arith.subf %511, %512 : vector<1x128xf32>
    %cst_229 = arith.constant 1.000000e+00 : f32
    %514 = vector.broadcast %cst_229 : f32 to vector<1x128xf32>
    %515 = arith.addf %501, %514 : vector<1x128xf32>
    %cst_230 = arith.constant 8.000000e+00 : f32
    %516 = vector.broadcast %cst_230 : f32 to vector<1x128xf32>
    %517 = arith.mulf %515, %516 : vector<1x128xf32>
    %cst_231 = arith.constant 5.000000e-01 : f32
    %518 = vector.broadcast %cst_231 : f32 to vector<1x128xf32>
    %519 = arith.subf %517, %518 : vector<1x128xf32>
    %520 = vector.broadcast %513 : vector<1x128xf32> to vector<16x128xf32>
    %521 = arith.subf %520, %37 : vector<16x128xf32>
    %522 = math.absf %521 : vector<16x128xf32>
    %cst_232 = arith.constant 1.000000e+00 : f32
    %523 = vector.broadcast %cst_232 : f32 to vector<16x128xf32>
    %524 = arith.subf %523, %522 : vector<16x128xf32>
    %cst_233 = arith.constant 0.000000e+00 : f32
    %525 = vector.broadcast %cst_233 : f32 to vector<16x128xf32>
    %526 = arith.maximumf %525, %524 : vector<16x128xf32>
    %527 = vector.broadcast %519 : vector<1x128xf32> to vector<16x128xf32>
    %528 = arith.subf %527, %35 : vector<16x128xf32>
    %529 = math.absf %528 : vector<16x128xf32>
    %cst_234 = arith.constant 1.000000e+00 : f32
    %530 = vector.broadcast %cst_234 : f32 to vector<16x128xf32>
    %531 = arith.subf %530, %529 : vector<16x128xf32>
    %cst_235 = arith.constant 0.000000e+00 : f32
    %532 = vector.broadcast %cst_235 : f32 to vector<16x128xf32>
    %533 = arith.maximumf %532, %531 : vector<16x128xf32>
    %cst_236 = arith.constant dense<0.000000e+00> : vector<48x128xf32>
    %534 = tpu.matmul %9, %526, %cst_236 {dimension_numbers = #tpu.dot_dimension_numbers<[1], [0], [0], [1], [0, 0, 1, 1], [], []>} : vector<48x16xf32>, vector<16x128xf32>, vector<48x128xf32> -> vector<48x128xf32>
    %535 = vector.extract_strided_slice %534 {offsets = [0, 0], sizes = [16, 128], strides = [1, 1]} : vector<48x128xf32> to vector<16x128xf32>
    %536 = arith.mulf %535, %533 : vector<16x128xf32>
    %cst_237 = arith.constant dense<0.000000e+00> : vector<128xf32>
    %537 = vector.multi_reduction <add>, %536, %cst_237 [0] : vector<16x128xf32> to vector<128xf32>
    %538 = vector.shape_cast %537 : vector<128xf32> to vector<1x128xf32>
    %c0_238 = arith.constant 0 : index
    %c18 = arith.constant 18 : index
    %c0_239 = arith.constant 0 : index
    %539 = vector.load %arg5[%c0_238, %c18, %c0_239] : memref<1x27x128xf32, #tpu.memory_space<vmem>>, vector<1x1x128xf32>
    %540 = vector.shape_cast %539 : vector<1x1x128xf32> to vector<1x128xf32>
    %541 = vector.shape_cast %538 : vector<1x128xf32> to vector<1x1x128xf32>
    tpu.vector_store %arg5[%c0_238, %c18, %c0_239], %541 {strides = array<i32>} : memref<1x27x128xf32, #tpu.memory_space<vmem>>, vector<1x1x128xf32>,
    %542 = vector.extract_strided_slice %534 {offsets = [16, 0], sizes = [16, 128], strides = [1, 1]} : vector<48x128xf32> to vector<16x128xf32>
    %543 = arith.mulf %542, %533 : vector<16x128xf32>
    %cst_240 = arith.constant dense<0.000000e+00> : vector<128xf32>
    %544 = vector.multi_reduction <add>, %543, %cst_240 [0] : vector<16x128xf32> to vector<128xf32>
    %545 = vector.shape_cast %544 : vector<128xf32> to vector<1x128xf32>
    %c0_241 = arith.constant 0 : index
    %c19 = arith.constant 19 : index
    %c0_242 = arith.constant 0 : index
    %546 = vector.load %arg5[%c0_241, %c19, %c0_242] : memref<1x27x128xf32, #tpu.memory_space<vmem>>, vector<1x1x128xf32>
    %547 = vector.shape_cast %546 : vector<1x1x128xf32> to vector<1x128xf32>
    %548 = vector.shape_cast %545 : vector<1x128xf32> to vector<1x1x128xf32>
    tpu.vector_store %arg5[%c0_241, %c19, %c0_242], %548 {strides = array<i32>} : memref<1x27x128xf32, #tpu.memory_space<vmem>>, vector<1x1x128xf32>,
    %549 = vector.extract_strided_slice %534 {offsets = [32, 0], sizes = [16, 128], strides = [1, 1]} : vector<48x128xf32> to vector<16x128xf32>
    %550 = arith.mulf %549, %533 : vector<16x128xf32>
    %cst_243 = arith.constant dense<0.000000e+00> : vector<128xf32>
    %551 = vector.multi_reduction <add>, %550, %cst_243 [0] : vector<16x128xf32> to vector<128xf32>
    %552 = vector.shape_cast %551 : vector<128xf32> to vector<1x128xf32>
    %c0_244 = arith.constant 0 : index
    %c20 = arith.constant 20 : index
    %c0_245 = arith.constant 0 : index
    %553 = vector.load %arg5[%c0_244, %c20, %c0_245] : memref<1x27x128xf32, #tpu.memory_space<vmem>>, vector<1x1x128xf32>
    %554 = vector.shape_cast %553 : vector<1x1x128xf32> to vector<1x128xf32>
    %555 = vector.shape_cast %552 : vector<1x128xf32> to vector<1x1x128xf32>
    tpu.vector_store %arg5[%c0_244, %c20, %c0_245], %555 {strides = array<i32>} : memref<1x27x128xf32, #tpu.memory_space<vmem>>, vector<1x1x128xf32>,
    %cst_246 = arith.constant 1.000000e+00 : f32
    %556 = vector.broadcast %cst_246 : f32 to vector<1x128xf32>
    %557 = arith.mulf %22, %556 : vector<1x128xf32>
    %cst_247 = arith.constant 5.000000e-01 : f32
    %558 = vector.broadcast %cst_247 : f32 to vector<1x128xf32>
    %559 = arith.mulf %25, %558 : vector<1x128xf32>
    %560 = arith.addf %557, %559 : vector<1x128xf32>
    %561 = arith.addf %560, %26 : vector<1x128xf32>
    %cst_248 = arith.constant -1.000000e+00 : f32
    %cst_249 = arith.constant 1.000000e+00 : f32
    %562 = vector.broadcast %cst_248 : f32 to vector<1x128xf32>
    %563 = arith.maximumf %562, %561 : vector<1x128xf32>
    %564 = vector.broadcast %cst_249 : f32 to vector<1x128xf32>
    %565 = arith.minimumf %564, %563 : vector<1x128xf32>
    %cst_250 = arith.constant 1.000000e+00 : f32
    %566 = vector.broadcast %cst_250 : f32 to vector<1x128xf32>
    %567 = arith.mulf %29, %566 : vector<1x128xf32>
    %cst_251 = arith.constant 5.000000e-01 : f32
    %568 = vector.broadcast %cst_251 : f32 to vector<1x128xf32>
    %569 = arith.mulf %32, %568 : vector<1x128xf32>
    %570 = arith.addf %567, %569 : vector<1x128xf32>
    %571 = arith.addf %570, %33 : vector<1x128xf32>
    %cst_252 = arith.constant -1.000000e+00 : f32
    %cst_253 = arith.constant 1.000000e+00 : f32
    %572 = vector.broadcast %cst_252 : f32 to vector<1x128xf32>
    %573 = arith.maximumf %572, %571 : vector<1x128xf32>
    %574 = vector.broadcast %cst_253 : f32 to vector<1x128xf32>
    %575 = arith.minimumf %574, %573 : vector<1x128xf32>
    %c0_254 = arith.constant 0 : index
    %c7_255 = arith.constant 7 : index
    %c0_256 = arith.constant 0 : index
    %576 = vector.load %arg6[%c0_254, %c7_255, %c0_256] : memref<1x18x128xf32, #tpu.memory_space<vmem>>, vector<1x1x128xf32>
    %577 = vector.shape_cast %576 : vector<1x1x128xf32> to vector<1x128xf32>
    %578 = vector.shape_cast %565 : vector<1x128xf32> to vector<1x1x128xf32>
    tpu.vector_store %arg6[%c0_254, %c7_255, %c0_256], %578 {strides = array<i32>} : memref<1x18x128xf32, #tpu.memory_space<vmem>>, vector<1x1x128xf32>,
    %c0_257 = arith.constant 0 : index
    %c16_258 = arith.constant 16 : index
    %c0_259 = arith.constant 0 : index
    %579 = vector.load %arg6[%c0_257, %c16_258, %c0_259] : memref<1x18x128xf32, #tpu.memory_space<vmem>>, vector<1x1x128xf32>
    %580 = vector.shape_cast %579 : vector<1x1x128xf32> to vector<1x128xf32>
    %581 = vector.shape_cast %575 : vector<1x128xf32> to vector<1x1x128xf32>
    tpu.vector_store %arg6[%c0_257, %c16_258, %c0_259], %581 {strides = array<i32>} : memref<1x18x128xf32, #tpu.memory_space<vmem>>, vector<1x1x128xf32>,
    %cst_260 = arith.constant 1.000000e+00 : f32
    %582 = vector.broadcast %cst_260 : f32 to vector<1x128xf32>
    %583 = arith.addf %565, %582 : vector<1x128xf32>
    %cst_261 = arith.constant 8.000000e+00 : f32
    %584 = vector.broadcast %cst_261 : f32 to vector<1x128xf32>
    %585 = arith.mulf %583, %584 : vector<1x128xf32>
    %cst_262 = arith.constant 5.000000e-01 : f32
    %586 = vector.broadcast %cst_262 : f32 to vector<1x128xf32>
    %587 = arith.subf %585, %586 : vector<1x128xf32>
    %cst_263 = arith.constant 1.000000e+00 : f32
    %588 = vector.broadcast %cst_263 : f32 to vector<1x128xf32>
    %589 = arith.addf %575, %588 : vector<1x128xf32>
    %cst_264 = arith.constant 8.000000e+00 : f32
    %590 = vector.broadcast %cst_264 : f32 to vector<1x128xf32>
    %591 = arith.mulf %589, %590 : vector<1x128xf32>
    %cst_265 = arith.constant 5.000000e-01 : f32
    %592 = vector.broadcast %cst_265 : f32 to vector<1x128xf32>
    %593 = arith.subf %591, %592 : vector<1x128xf32>
    %594 = vector.broadcast %587 : vector<1x128xf32> to vector<16x128xf32>
    %595 = arith.subf %594, %37 : vector<16x128xf32>
    %596 = math.absf %595 : vector<16x128xf32>
    %cst_266 = arith.constant 1.000000e+00 : f32
    %597 = vector.broadcast %cst_266 : f32 to vector<16x128xf32>
    %598 = arith.subf %597, %596 : vector<16x128xf32>
    %cst_267 = arith.constant 0.000000e+00 : f32
    %599 = vector.broadcast %cst_267 : f32 to vector<16x128xf32>
    %600 = arith.maximumf %599, %598 : vector<16x128xf32>
    %601 = vector.broadcast %593 : vector<1x128xf32> to vector<16x128xf32>
    %602 = arith.subf %601, %35 : vector<16x128xf32>
    %603 = math.absf %602 : vector<16x128xf32>
    %cst_268 = arith.constant 1.000000e+00 : f32
    %604 = vector.broadcast %cst_268 : f32 to vector<16x128xf32>
    %605 = arith.subf %604, %603 : vector<16x128xf32>
    %cst_269 = arith.constant 0.000000e+00 : f32
    %606 = vector.broadcast %cst_269 : f32 to vector<16x128xf32>
    %607 = arith.maximumf %606, %605 : vector<16x128xf32>
    %cst_270 = arith.constant dense<0.000000e+00> : vector<48x128xf32>
    %608 = tpu.matmul %9, %600, %cst_270 {dimension_numbers = #tpu.dot_dimension_numbers<[1], [0], [0], [1], [0, 0, 1, 1], [], []>} : vector<48x16xf32>, vector<16x128xf32>, vector<48x128xf32> -> vector<48x128xf32>
    %609 = vector.extract_strided_slice %608 {offsets = [0, 0], sizes = [16, 128], strides = [1, 1]} : vector<48x128xf32> to vector<16x128xf32>
    %610 = arith.mulf %609, %607 : vector<16x128xf32>
    %cst_271 = arith.constant dense<0.000000e+00> : vector<128xf32>
    %611 = vector.multi_reduction <add>, %610, %cst_271 [0] : vector<16x128xf32> to vector<128xf32>
    %612 = vector.shape_cast %611 : vector<128xf32> to vector<1x128xf32>
    %c0_272 = arith.constant 0 : index
    %c21 = arith.constant 21 : index
    %c0_273 = arith.constant 0 : index
    %613 = vector.load %arg5[%c0_272, %c21, %c0_273] : memref<1x27x128xf32, #tpu.memory_space<vmem>>, vector<1x1x128xf32>
    %614 = vector.shape_cast %613 : vector<1x1x128xf32> to vector<1x128xf32>
    %615 = vector.shape_cast %612 : vector<1x128xf32> to vector<1x1x128xf32>
    tpu.vector_store %arg5[%c0_272, %c21, %c0_273], %615 {strides = array<i32>} : memref<1x27x128xf32, #tpu.memory_space<vmem>>, vector<1x1x128xf32>,
    %616 = vector.extract_strided_slice %608 {offsets = [16, 0], sizes = [16, 128], strides = [1, 1]} : vector<48x128xf32> to vector<16x128xf32>
    %617 = arith.mulf %616, %607 : vector<16x128xf32>
    %cst_274 = arith.constant dense<0.000000e+00> : vector<128xf32>
    %618 = vector.multi_reduction <add>, %617, %cst_274 [0] : vector<16x128xf32> to vector<128xf32>
    %619 = vector.shape_cast %618 : vector<128xf32> to vector<1x128xf32>
    %c0_275 = arith.constant 0 : index
    %c22 = arith.constant 22 : index
    %c0_276 = arith.constant 0 : index
    %620 = vector.load %arg5[%c0_275, %c22, %c0_276] : memref<1x27x128xf32, #tpu.memory_space<vmem>>, vector<1x1x128xf32>
    %621 = vector.shape_cast %620 : vector<1x1x128xf32> to vector<1x128xf32>
    %622 = vector.shape_cast %619 : vector<1x128xf32> to vector<1x1x128xf32>
    tpu.vector_store %arg5[%c0_275, %c22, %c0_276], %622 {strides = array<i32>} : memref<1x27x128xf32, #tpu.memory_space<vmem>>, vector<1x1x128xf32>,
    %623 = vector.extract_strided_slice %608 {offsets = [32, 0], sizes = [16, 128], strides = [1, 1]} : vector<48x128xf32> to vector<16x128xf32>
    %624 = arith.mulf %623, %607 : vector<16x128xf32>
    %cst_277 = arith.constant dense<0.000000e+00> : vector<128xf32>
    %625 = vector.multi_reduction <add>, %624, %cst_277 [0] : vector<16x128xf32> to vector<128xf32>
    %626 = vector.shape_cast %625 : vector<128xf32> to vector<1x128xf32>
    %c0_278 = arith.constant 0 : index
    %c23 = arith.constant 23 : index
    %c0_279 = arith.constant 0 : index
    %627 = vector.load %arg5[%c0_278, %c23, %c0_279] : memref<1x27x128xf32, #tpu.memory_space<vmem>>, vector<1x1x128xf32>
    %628 = vector.shape_cast %627 : vector<1x1x128xf32> to vector<1x128xf32>
    %629 = vector.shape_cast %626 : vector<1x128xf32> to vector<1x1x128xf32>
    tpu.vector_store %arg5[%c0_278, %c23, %c0_279], %629 {strides = array<i32>} : memref<1x27x128xf32, #tpu.memory_space<vmem>>, vector<1x1x128xf32>,
    %cst_280 = arith.constant 1.000000e+00 : f32
    %630 = vector.broadcast %cst_280 : f32 to vector<1x128xf32>
    %631 = arith.mulf %22, %630 : vector<1x128xf32>
    %cst_281 = arith.constant 1.000000e+00 : f32
    %632 = vector.broadcast %cst_281 : f32 to vector<1x128xf32>
    %633 = arith.mulf %25, %632 : vector<1x128xf32>
    %634 = arith.addf %631, %633 : vector<1x128xf32>
    %635 = arith.addf %634, %26 : vector<1x128xf32>
    %cst_282 = arith.constant -1.000000e+00 : f32
    %cst_283 = arith.constant 1.000000e+00 : f32
    %636 = vector.broadcast %cst_282 : f32 to vector<1x128xf32>
    %637 = arith.maximumf %636, %635 : vector<1x128xf32>
    %638 = vector.broadcast %cst_283 : f32 to vector<1x128xf32>
    %639 = arith.minimumf %638, %637 : vector<1x128xf32>
    %cst_284 = arith.constant 1.000000e+00 : f32
    %640 = vector.broadcast %cst_284 : f32 to vector<1x128xf32>
    %641 = arith.mulf %29, %640 : vector<1x128xf32>
    %cst_285 = arith.constant 1.000000e+00 : f32
    %642 = vector.broadcast %cst_285 : f32 to vector<1x128xf32>
    %643 = arith.mulf %32, %642 : vector<1x128xf32>
    %644 = arith.addf %641, %643 : vector<1x128xf32>
    %645 = arith.addf %644, %33 : vector<1x128xf32>
    %cst_286 = arith.constant -1.000000e+00 : f32
    %cst_287 = arith.constant 1.000000e+00 : f32
    %646 = vector.broadcast %cst_286 : f32 to vector<1x128xf32>
    %647 = arith.maximumf %646, %645 : vector<1x128xf32>
    %648 = vector.broadcast %cst_287 : f32 to vector<1x128xf32>
    %649 = arith.minimumf %648, %647 : vector<1x128xf32>
    %c0_288 = arith.constant 0 : index
    %c8_289 = arith.constant 8 : index
    %c0_290 = arith.constant 0 : index
    %650 = vector.load %arg6[%c0_288, %c8_289, %c0_290] : memref<1x18x128xf32, #tpu.memory_space<vmem>>, vector<1x1x128xf32>
    %651 = vector.shape_cast %650 : vector<1x1x128xf32> to vector<1x128xf32>
    %652 = vector.shape_cast %639 : vector<1x128xf32> to vector<1x1x128xf32>
    tpu.vector_store %arg6[%c0_288, %c8_289, %c0_290], %652 {strides = array<i32>} : memref<1x18x128xf32, #tpu.memory_space<vmem>>, vector<1x1x128xf32>,
    %c0_291 = arith.constant 0 : index
    %c17_292 = arith.constant 17 : index
    %c0_293 = arith.constant 0 : index
    %653 = vector.load %arg6[%c0_291, %c17_292, %c0_293] : memref<1x18x128xf32, #tpu.memory_space<vmem>>, vector<1x1x128xf32>
    %654 = vector.shape_cast %653 : vector<1x1x128xf32> to vector<1x128xf32>
    %655 = vector.shape_cast %649 : vector<1x128xf32> to vector<1x1x128xf32>
    tpu.vector_store %arg6[%c0_291, %c17_292, %c0_293], %655 {strides = array<i32>} : memref<1x18x128xf32, #tpu.memory_space<vmem>>, vector<1x1x128xf32>,
    %cst_294 = arith.constant 1.000000e+00 : f32
    %656 = vector.broadcast %cst_294 : f32 to vector<1x128xf32>
    %657 = arith.addf %639, %656 : vector<1x128xf32>
    %cst_295 = arith.constant 8.000000e+00 : f32
    %658 = vector.broadcast %cst_295 : f32 to vector<1x128xf32>
    %659 = arith.mulf %657, %658 : vector<1x128xf32>
    %cst_296 = arith.constant 5.000000e-01 : f32
    %660 = vector.broadcast %cst_296 : f32 to vector<1x128xf32>
    %661 = arith.subf %659, %660 : vector<1x128xf32>
    %cst_297 = arith.constant 1.000000e+00 : f32
    %662 = vector.broadcast %cst_297 : f32 to vector<1x128xf32>
    %663 = arith.addf %649, %662 : vector<1x128xf32>
    %cst_298 = arith.constant 8.000000e+00 : f32
    %664 = vector.broadcast %cst_298 : f32 to vector<1x128xf32>
    %665 = arith.mulf %663, %664 : vector<1x128xf32>
    %cst_299 = arith.constant 5.000000e-01 : f32
    %666 = vector.broadcast %cst_299 : f32 to vector<1x128xf32>
    %667 = arith.subf %665, %666 : vector<1x128xf32>
    %668 = vector.broadcast %661 : vector<1x128xf32> to vector<16x128xf32>
    %669 = arith.subf %668, %37 : vector<16x128xf32>
    %670 = math.absf %669 : vector<16x128xf32>
    %cst_300 = arith.constant 1.000000e+00 : f32
    %671 = vector.broadcast %cst_300 : f32 to vector<16x128xf32>
    %672 = arith.subf %671, %670 : vector<16x128xf32>
    %cst_301 = arith.constant 0.000000e+00 : f32
    %673 = vector.broadcast %cst_301 : f32 to vector<16x128xf32>
    %674 = arith.maximumf %673, %672 : vector<16x128xf32>
    %675 = vector.broadcast %667 : vector<1x128xf32> to vector<16x128xf32>
    %676 = arith.subf %675, %35 : vector<16x128xf32>
    %677 = math.absf %676 : vector<16x128xf32>
    %cst_302 = arith.constant 1.000000e+00 : f32
    %678 = vector.broadcast %cst_302 : f32 to vector<16x128xf32>
    %679 = arith.subf %678, %677 : vector<16x128xf32>
    %cst_303 = arith.constant 0.000000e+00 : f32
    %680 = vector.broadcast %cst_303 : f32 to vector<16x128xf32>
    %681 = arith.maximumf %680, %679 : vector<16x128xf32>
    %cst_304 = arith.constant dense<0.000000e+00> : vector<48x128xf32>
    %682 = tpu.matmul %9, %674, %cst_304 {dimension_numbers = #tpu.dot_dimension_numbers<[1], [0], [0], [1], [0, 0, 1, 1], [], []>} : vector<48x16xf32>, vector<16x128xf32>, vector<48x128xf32> -> vector<48x128xf32>
    %683 = vector.extract_strided_slice %682 {offsets = [0, 0], sizes = [16, 128], strides = [1, 1]} : vector<48x128xf32> to vector<16x128xf32>
    %684 = arith.mulf %683, %681 : vector<16x128xf32>
    %cst_305 = arith.constant dense<0.000000e+00> : vector<128xf32>
    %685 = vector.multi_reduction <add>, %684, %cst_305 [0] : vector<16x128xf32> to vector<128xf32>
    %686 = vector.shape_cast %685 : vector<128xf32> to vector<1x128xf32>
    %c0_306 = arith.constant 0 : index
    %c24 = arith.constant 24 : index
    %c0_307 = arith.constant 0 : index
    %687 = vector.load %arg5[%c0_306, %c24, %c0_307] : memref<1x27x128xf32, #tpu.memory_space<vmem>>, vector<1x1x128xf32>
    %688 = vector.shape_cast %687 : vector<1x1x128xf32> to vector<1x128xf32>
    %689 = vector.shape_cast %686 : vector<1x128xf32> to vector<1x1x128xf32>
    tpu.vector_store %arg5[%c0_306, %c24, %c0_307], %689 {strides = array<i32>} : memref<1x27x128xf32, #tpu.memory_space<vmem>>, vector<1x1x128xf32>,
    %690 = vector.extract_strided_slice %682 {offsets = [16, 0], sizes = [16, 128], strides = [1, 1]} : vector<48x128xf32> to vector<16x128xf32>
    %691 = arith.mulf %690, %681 : vector<16x128xf32>
    %cst_308 = arith.constant dense<0.000000e+00> : vector<128xf32>
    %692 = vector.multi_reduction <add>, %691, %cst_308 [0] : vector<16x128xf32> to vector<128xf32>
    %693 = vector.shape_cast %692 : vector<128xf32> to vector<1x128xf32>
    %c0_309 = arith.constant 0 : index
    %c25 = arith.constant 25 : index
    %c0_310 = arith.constant 0 : index
    %694 = vector.load %arg5[%c0_309, %c25, %c0_310] : memref<1x27x128xf32, #tpu.memory_space<vmem>>, vector<1x1x128xf32>
    %695 = vector.shape_cast %694 : vector<1x1x128xf32> to vector<1x128xf32>
    %696 = vector.shape_cast %693 : vector<1x128xf32> to vector<1x1x128xf32>
    tpu.vector_store %arg5[%c0_309, %c25, %c0_310], %696 {strides = array<i32>} : memref<1x27x128xf32, #tpu.memory_space<vmem>>, vector<1x1x128xf32>,
    %697 = vector.extract_strided_slice %682 {offsets = [32, 0], sizes = [16, 128], strides = [1, 1]} : vector<48x128xf32> to vector<16x128xf32>
    %698 = arith.mulf %697, %681 : vector<16x128xf32>
    %cst_311 = arith.constant dense<0.000000e+00> : vector<128xf32>
    %699 = vector.multi_reduction <add>, %698, %cst_311 [0] : vector<16x128xf32> to vector<128xf32>
    %700 = vector.shape_cast %699 : vector<128xf32> to vector<1x128xf32>
    %c0_312 = arith.constant 0 : index
    %c26 = arith.constant 26 : index
    %c0_313 = arith.constant 0 : index
    %701 = vector.load %arg5[%c0_312, %c26, %c0_313] : memref<1x27x128xf32, #tpu.memory_space<vmem>>, vector<1x1x128xf32>
    %702 = vector.shape_cast %701 : vector<1x1x128xf32> to vector<1x128xf32>
    %703 = vector.shape_cast %700 : vector<1x128xf32> to vector<1x1x128xf32>
    tpu.vector_store %arg5[%c0_312, %c26, %c0_313], %703 {strides = array<i32>} : memref<1x27x128xf32, #tpu.memory_space<vmem>>, vector<1x1x128xf32>,
    return
  }
  func.func @transform_0(%arg0: i32, %arg1: i32) -> (i32, i32) {
    %c0_i32 = arith.constant 0 : i32
    %c0_i32_0 = arith.constant 0 : i32
    %c0_i32_1 = arith.constant 0 : i32
    return %c0_i32, %c0_i32_0 : i32, i32
  }
  func.func @transform_1(%arg0: i32, %arg1: i32) -> (i32, i32, i32) {
    %c0_i32 = arith.constant 0 : i32
    %c0_i32_0 = arith.constant 0 : i32
    return %arg0, %c0_i32, %arg1 : i32, i32, i32
  }
  func.func @transform_2(%arg0: i32, %arg1: i32) -> (i32, i32, i32) {
    %c0_i32 = arith.constant 0 : i32
    %c0_i32_0 = arith.constant 0 : i32
    %c0_i32_1 = arith.constant 0 : i32
    return %arg0, %c0_i32, %c0_i32_0 : i32, i32, i32
  }
  func.func @transform_3(%arg0: i32, %arg1: i32) -> (i32, i32, i32) {
    %c0_i32 = arith.constant 0 : i32
    %c0_i32_0 = arith.constant 0 : i32
    return %arg0, %c0_i32, %arg1 : i32, i32, i32
  }
  func.func @transform_4(%arg0: i32, %arg1: i32) -> (i32, i32, i32) {
    %c0_i32 = arith.constant 0 : i32
    %c0_i32_0 = arith.constant 0 : i32
    return %arg0, %c0_i32, %arg1 : i32, i32, i32
  }
}

</mosaic_0001>

<bundles_post_ra>
// kernel: tpu_custom_call.1
= control target key start
LH: loop header
LB: loop body
LE: loop exit
PB: predicated region body
PF: predicated region fallthrough
CT: control target
= control target key end

     0   :  { %10 = vsyncpa [#allocation3], 0  ;;  %s2407_s15 = smov 0   ;;  %s2409_s16 = smov 0   ;;  %s2892_s0 = inlined_call_operand.vmem [shape: f32[2,3], index: 0, kind: input, shape index: {}]   ;;  %s2893_s1 = inlined_call_operand.vmem [shape: f32[2,6,128], index: 1, kind: input, shape index: {}]   ;;  %s2894_s2 = inlined_call_operand.vmem [shape: f32[2,48,16], index: 2, kind: input, shape index: {}]   ;;  %s2895_s3 = inlined_call_operand.vmem [shape: f32[2,27,128], index: 3, kind: output, shape index: {0}]   ;;  %s2896_s4 = inlined_call_operand.vmem [shape: f32[2,18,128], index: 4, kind: output, shape index: {1}]  }
   0x1   :  { %s2411_s17 = smov 0  }
   0x2 LB: > { %s2002_s18 = sadd.s32 4294967295, %s2379_s17   ;;  %s28_s19 = sadd.s32 1, %s2375_s16  ;;  %s2379_s17 = sphi %s2411_s17, %s16_s17   ;;  %s2375_s16 = sphi %s2409_s16, %s2900_s16   ;;  %s2371_s15 = sphi %s2407_s15, %s2899_s15  }
   0x3   : > { %p30_p0 = scmp.ge.s32.totalorder %s28_s19, 2  ;;  %p2004_p1 = scmp.ge.s32.totalorder %s2379_s17, 1 }
   0x4   : > { %p164_p2 = scmp.lt.s32.totalorder %s2379_s17, 3  ;;  %p2432_p4 = scmp.eq.s32.totalorder %s2002_s18, 0 }
   0x5   : > { %s2902_s19 = smov (%p30_p0, %s28_s19), 0  ;;  %s177_s24 = sshll.u32 %s2892_s0, 4  ;;  %s178_s24 = int_to_ptr.vmem [resolvable:$true] %s177_s24 }
   0x6   : > { %p2428_p3 = pnand %p2004_p1, %p164_p2  ;;  %s2338_s25 = scalar_lea.vmem %s178_s24, 32 }
   0x7   : > { %p2339_p7 = scmp.ne.s32.totalorder %s178_s24, %s2338_s25  ;;  %p2346_p11 = scmp.lt.s32.totalorder %s178_s24, %s178_s24 }
   0x8   : > { %p2307_p5 = pneg %p2428_p3  ;;  %p2347_p12 = scmp.lt.s32.totalorder %s2338_s25, %s2338_s25 }
   0xa   : > { %p2308_p6 = pnand %p2432_p4, %p2307_p5  ;;  %p2348_p13 = por %p2347_p12, %p2346_p11 }
   0xc   : > { %p2340_p8 = pneg %p2308_p6 }
   0xe   : > { %p2341_p9 = pnand %p2340_p8, %p2339_p7 }
  0x10   : > { %p2342_p10 = pneg %p2341_p9 }
  0x12   : > { %p2349_p0 = pnand %p2348_p13, %p2342_p10 }
  0x14   : > { %2352 = shalt.err (!%p2349_p0)
}
  0x15   : > { %s2381_s26 = smov [#allocation2]   ;;  %208 = sbr.rel (%p2428_p3) target bundleno = 346 (0x15a), region = 32 }
  0x16   : > { %2310 = dma.vmem_to_smem (!%p2308_p6), %s178_s24, 32, %s2381_s26, [#allocation3]  }
  0x1a   : > { %2366 = dma.done.wait (%p2432_p4), [#allocation3], 32  }
  0x1b   : > { %2368 = vsyncadd (%p2432_p4), [#allocation3], 4294967264 }
  0x1c   : > { %214 = sfence }
  0x1d   : > { %p253_p1 = scmp.lt.s32.totalorder %s2371_s15, 1  ;;  %s2014_s27 = sshll.u32 %s2371_s15, 7  ;;  %vm370_vm0 = vcmask 130048   ;;  %v315_v11 = vlaneseq }
  0x1e   : > { %s2451_s28 = sld [smem:[#allocation2 + %s2014_s27]]  ;;  %s283_s29 = sadd.s32 1, %s2014_s27 }
  0x1f   : > { %s2904_s15 = smov (!%p253_p1, %s2371_s15), 1  ;;  %s284_s30 = sld [smem:[#allocation2 + %s283_s29]]  ;;  %v2490_v21 = vshrl.u32 %v315_v11, 7 }
  0x20   : > { %s2009_s5 = sshll.u32 %s2904_s15, 3  ;;  %s285_s9 = sadd.s32 2, %s2014_s27 }
  0x21   : > { %s259_s8 = scalar_lea.vmem %s2893_s1, %s2009_s5  ;;  %s2301_s10 = smul.u32 48, %s2904_s15  ;;  %v317_v44 = vadd.s32 8, %v2490_v21  ;;  %v2518_v52 = vcvt.s32.f32 %v2490_v21  ;;  %v2521_v53 = vsub.s32 0, %v2490_v21 }
  0x22   : > { %v287_v0 = vld [vmem:[%s259_s8] sm:$0x3f]  ;;  %s286_s14 = sld [smem:[#allocation2 + %s285_s9]]  ;;  %s2302_s18 = smul.u32 24, %s2904_s15 }
  0x23   : > { %s2465_s13 = scalar_lea.vmem %s2894_s2, %s2301_s10  ;;  %v2528_v60 = vcvt.s32.f32 %v317_v44  ;;  %s2107_s23 = sshll.u32 %s2904_s15, 5 }
  0x24   : > { %v296_v2 = vstv %s2451_s28  ;;  %v2468_v4 = vld [vmem:[%s2465_s13] sm:$0xff]  ;;  %v2471_v5 = vld [vmem:[%s2465_s13 + $0x10] sm:$0xff]  ;;  %s2497_s22 = scalar_lea.vmem %s2896_s4, %s2302_s18  ;;  %s2813_s25 = scalar_lea.vmem %s2895_s3, %s2107_s23 }
  0x25   : > { %v294_v1 = vstv %s284_s30  ;;  %2184 = vmatprep.mubr.msk.f32.mxu0 %vm370_vm0, %v2468_v4  ;;  %2187 = vmatprep.mubr.msk.f32.mxu1 %vm370_vm0, %v2471_v5 }
  0x26   : > { %v295_v3 = vadd.f32 %v294_v1, %v287_v0 }
  0x28   : > { %v297_v6 = vmul.f32 %v296_v2, %v295_v3  ;;  %v298_v12 = vstv %s286_s14 }
  0x29   : > { %v299_v23 = vadd.f32 %v298_v12, %v287_v0 }
  0x2a   : > { %v2479_v7 = vrot.slane %v297_v6, 2  ;;  %v305_v8 = vrot.slane %v297_v6, 1 }
  0x2b   : > { %v300_v55 = vmul.f32 %v299_v23, %v296_v2 }
  0x2c   : > { %v2482_v9 = vsub.f32 %v297_v6, %v2479_v7  ;;  %v307_v10 = vsub.f32 %v297_v6, %v305_v8 }
  0x2d   : > { %v312_v12 = vrot.slane %v300_v55, 1 }
  0x2e   : > { %v320_v13 = vmul.f32 0.0, %v2482_v9  ;;  %v321_v14 = vmul.f32 0.0, %v307_v10  ;;  %v514_v15 = vmul.f32 0.5, %v307_v10  ;;  %v2485_v16 = vrot.slane %v307_v10, 1 }
  0x2f   : > { %v858_v17 = vmul.f32 0.5, %v2482_v9 }
  0x30   : > { %v323_v18 = vrot.slane %v321_v14, 1  ;;  %v516_v19 = vrot.slane %v514_v15, 1  ;;  %v690_v20 = vadd.f32 %v2485_v16, %v320_v13 }
  0x31   : > { %v1190_v22 = vadd.f32 %v858_v17, %v2485_v16 }
  0x32   : > { %v325_v24 = vadd.f32 %v323_v18, %v320_v13  ;;  %v518_v25 = vadd.f32 %v516_v19, %v320_v13  ;;  %v691_v26 = vadd.f32 %v690_v20, %v2479_v7  ;;  %v859_v27 = vadd.f32 %v858_v17, %v323_v18 }
  0x33   : > { %v1025_v28 = vadd.f32 %v858_v17, %v516_v19  ;;  %v1191_v29 = vadd.f32 %v1190_v22, %v2479_v7  ;;  %v1355_v30 = vadd.f32 %v323_v18, %v2482_v9  ;;  %v1520_v31 = vadd.f32 %v516_v19, %v2482_v9 }
  0x34   : > { %v326_v32 = vadd.f32 %v325_v24, %v2479_v7  ;;  %v519_v33 = vadd.f32 %v518_v25, %v2479_v7  ;;  %v2035_v34 = vclamps-f32 %v691_v26, 1.0  ;;  %v860_v35 = vadd.f32 %v859_v27, %v2479_v7 }
  0x35   : > { %v1026_v36 = vadd.f32 %v1025_v28, %v2479_v7  ;;  %v2065_v37 = vclamps-f32 %v1191_v29, 1.0  ;;  %v1356_v38 = vadd.f32 %v1355_v30, %v2479_v7  ;;  %v2508_v39 = vadd.f32 %v1520_v31, %v2479_v7 }
  0x36   : > { %v2015_v40 = vclamps-f32 %v326_v32, 1.0  ;;  %v2025_v41 = vclamps-f32 %v519_v33, 1.0  ;;  %701 = vst [vmem:[%s2497_s22 + $0x2] sm:$0x1] %v2035_v34  ;;  %v703_v42 = vadd.f32 1.0, %v2035_v34  ;;  %v2045_v43 = vclamps-f32 %v860_v35, 1.0 }
  0x37   : > { %v2055_v45 = vclamps-f32 %v1026_v36, 1.0  ;;  %1198 = vst [vmem:[%s2497_s22 + $0x5] sm:$0x1] %v2065_v37  ;;  %v2075_v46 = vclamps-f32 %v1356_v38, 1.0  ;;  %v2085_v47 = vclamps-f32 %v2508_v39, 1.0  ;;  %v1200_v62 = vadd.f32 1.0, %v2065_v37 }
  0x38   : > { %338 = vst [vmem:[%s2497_s22] sm:$0x1] %v2015_v40  ;;  %v340_v48 = vadd.f32 1.0, %v2015_v40  ;;  %530 = vst [vmem:[%s2497_s22 + $0x1] sm:$0x1] %v2025_v41  ;;  %v532_v49 = vadd.f32 1.0, %v2025_v41  ;;  %v704_v50 = vmul.f32 8.0, %v703_v42  ;;  %v2545_v36 = vsub.f32 %v300_v55, %v312_v12 }
  0x39   : > { %868 = vst [vmem:[%s2497_s22 + $0x3] sm:$0x1] %v2045_v43  ;;  %v870_v51 = vadd.f32 1.0, %v2045_v43  ;;  %1033 = vst [vmem:[%s2497_s22 + $0x4] sm:$0x1] %v2055_v45  ;;  %v1035_v54 = vadd.f32 1.0, %v2055_v45  ;;  %v1685_v40 = vadd.f32 %v2485_v16, %v2482_v9 }
  0x3a   : > { %1363 = vst [vmem:[%s2497_s22 + $0x6] sm:$0x1] %v2075_v46  ;;  %1528 = vst [vmem:[%s2497_s22 + $0x7] sm:$0x1] %v2085_v47  ;;  %v341_v56 = vmul.f32 8.0, %v340_v48  ;;  %v533_v57 = vmul.f32 8.0, %v532_v49 }
  0x3b   : > { %v2037_v58 = vadd.f32 -0.5, %v704_v50  ;;  %v871_v59 = vmul.f32 8.0, %v870_v51  ;;  %v1036_v61 = vmul.f32 8.0, %v1035_v54  ;;  %v1365_v63 = vadd.f32 1.0, %v2075_v46  ;;  %v2559_v16 = vld [vmem:[%s2465_s13 + $0x8] sm:$0xff] }
  0x3c   : > { %v2017_v0 = vadd.f32 -0.5, %v341_v56  ;;  %v2027_v1 = vadd.f32 -0.5, %v533_v57  ;;  %v1201_v17 = vmul.f32 8.0, %v1200_v62  ;;  %v2543_v32 = vrot.slane %v300_v55, 2 }
  0x3d   : > { %v712_v3 = vrot.slane %v2037_v58, %v2521_v53  ;;  %v2047_v6 = vadd.f32 -0.5, %v871_v59  ;;  %v2057_v8 = vadd.f32 -0.5, %v1036_v61  ;;  %v1366_v22 = vmul.f32 8.0, %v1365_v63 }
  0x3e   : > { %v349_v10 = vrot.slane %v2017_v0, %v2521_v53  ;;  %v541_v11 = vrot.slane %v2027_v1, %v2521_v53  ;;  %v2067_v31 = vadd.f32 -0.5, %v1201_v17  ;;  %v1530_v44 = vadd.f32 1.0, %v2085_v47  ;;  %v2562_v47 = vld [vmem:[%s2465_s13 + $0x18] sm:$0xff] }
  0x3f   : > { %v714_v2 = vsub.f32 %v712_v3, %v2528_v60  ;;  %v713_v13 = vsub.f32 %v712_v3, %v2518_v52  ;;  %v879_v14 = vrot.slane %v2047_v6, %v2521_v53  ;;  %v1044_v15 = vrot.slane %v2057_v8, %v2521_v53  ;;  %v2573_v3 = vld [vmem:[%s2465_s13 + $0x20] sm:$0xff] }
  0x40   : > { %v351_v18 = vsub.f32 %v349_v10, %v2528_v60  ;;  %v350_v19 = vsub.f32 %v349_v10, %v2518_v52  ;;  %v543_v20 = vsub.f32 %v541_v11, %v2528_v60  ;;  %v542_v24 = vsub.f32 %v541_v11, %v2518_v52 }
  0x41   : > { %v716_v23 = vand.u32 2147483647, %v714_v2  ;;  %v881_v28 = vsub.f32 %v879_v14, %v2528_v60  ;;  %v715_v29 = vand.u32 2147483647, %v713_v13  ;;  %v1046_v30 = vsub.f32 %v1044_v15, %v2528_v60  ;;  %v2580_v2 = vld [vmem:[%s2465_s13 + $0x28] sm:$0xff] }
  0x42   : > { %v353_v25 = vand.u32 2147483647, %v351_v18  ;;  %v352_v26 = vand.u32 2147483647, %v350_v19  ;;  %v545_v27 = vand.u32 2147483647, %v543_v20  ;;  %v880_v48 = vsub.f32 %v879_v14, %v2518_v52 }
  0x43   : > { %v2077_v35 = vadd.f32 -0.5, %v1366_v22  ;;  %v718_v38 = vsub.f32 1.0, %v716_v23  ;;  %v544_v39 = vand.u32 2147483647, %v542_v24  ;;  %v883_v43 = vand.u32 2147483647, %v881_v28 }
  0x44   : > { %v355_v33 = vsub.f32 1.0, %v353_v25  ;;  %v354_v34 = vsub.f32 1.0, %v352_v26  ;;  %v547_v37 = vsub.f32 1.0, %v545_v27  ;;  %v717_v45 = vsub.f32 1.0, %v715_v29 }
  0x45   : > { %v1048_v46 = vand.u32 2147483647, %v1046_v30  ;;  %v2551_v49 = vrot.slane %v2067_v31, %v2521_v53  ;;  %v1045_v50 = vsub.f32 %v1044_v15, %v2518_v52  ;;  %v1374_v51 = vrot.slane %v2077_v35, %v2521_v53 }
  0x46   : > { %v357_v41 = vmax.f32 %v355_v33, 0.0  ;;  %v356_v42 = vmax.f32 %v354_v34, 0.0  ;;  %v2556_v9 = vsub.f32 %v300_v55, %v2543_v32  ;;  %v549_v54 = vmax.f32 %v547_v37, 0.0 }
  0x47   : > { %v720_v56 = vmax.f32 %v718_v38, 0.0  ;;  %v546_v57 = vsub.f32 1.0, %v544_v39  ;;  %v885_v58 = vsub.f32 1.0, %v883_v43  ;;  %v1531_v59 = vmul.f32 8.0, %v1530_v44 }
  0x48   : > { %2180 = vmatprep.subr.mxu0 %v357_v41  ;;  %2297 = vmatprep.subr.mxu1 %v357_v41  ;;  %v1686_v61 = vadd.f32 %v1685_v40, %v2479_v7  ;;  %v330_v62 = vmul.f32 0.0, %v2545_v36  ;;  %v719_v55 = vmax.f32 %v717_v45, 0.0  ;;  %v1050_v63 = vsub.f32 1.0, %v1048_v46 }
  0x49   : > { %2181 = vmatpush3.msra.mxu0 %v357_v41  ;;  %2299 = vmatpush3.msra.mxu1 %v357_v41  ;;  %v882_v0 = vand.u32 2147483647, %v880_v48  ;;  %v1211_v1 = vsub.f32 %v2551_v49, %v2528_v60  ;;  %v1047_v7 = vand.u32 2147483647, %v1045_v50  ;;  %v1376_v6 = vsub.f32 %v1374_v51, %v2528_v60 }
  0x4a   : > { %2182 = vmatprep.subr.mxu0 %v356_v42  ;;  %2298 = vmatprep.subr.mxu1 %v356_v42  ;;  %v2095_v8 = vclamps-f32 %v1686_v61, 1.0  ;;  %v2577_v10 = vmul.f32 0.0, %v2556_v9  ;;  %v548_v11 = vmax.f32 %v546_v57, 0.0  ;;  %v887_v12 = vmax.f32 %v885_v58, 0.0 }
  0x4b   : > { %2183 = vmatpush3.msra.mxu0 %v356_v42  ;;  %2300 = vmatpush3.msra.mxu1 %v356_v42  ;;  %v2087_v13 = vadd.f32 -0.5, %v1531_v59  ;;  %v2583_v15 = vrot.slane %v330_v62, 1  ;;  %v1052_v17 = vmax.f32 %v1050_v63, 0.0  ;;  %v884_v18 = vsub.f32 1.0, %v882_v0 }
  0x4c   : > { %2185 = vmatmul.mubr.msk.f32.vlgmr.msra.gmra.mxu0 %vm370_vm0, %v2559_v16  ;;  %2188 = vmatmul.mubr.msk.f32.vlgmr.msra.gmra.mxu1 %vm370_vm0, %v2562_v47  ;;  %1693 = vst [vmem:[%s2497_s22 + $0x8] sm:$0x1] %v2095_v8  ;;  %v1695_v14 = vadd.f32 1.0, %v2095_v8  ;;  %v1213_v19 = vand.u32 2147483647, %v1211_v1  ;;  %v1375_v20 = vsub.f32 %v1374_v51, %v2518_v52  ;;  %v1049_v22 = vsub.f32 1.0, %v1047_v7 }
  0x4d   : > { %2193 = vmatprep.subr.mxu1 %v549_v54  ;;  %2206 = vmatprep.subr.mxu0 %v720_v56  ;;  %v1378_v23 = vand.u32 2147483647, %v1376_v6  ;;  %v334_v25 = vadd.f32 %v2583_v15, %v2577_v10  ;;  %v1210_v26 = vsub.f32 %v2551_v49, %v2518_v52  ;;  %v886_v29 = vmax.f32 %v884_v18, 0.0 }
  0x4e   : > { %2194 = vmatpush3.msra.mxu1 %v549_v54  ;;  %2207 = vmatpush3.msra.mxu0 %v720_v56  ;;  %v1696_v24 = vmul.f32 8.0, %v1695_v14  ;;  %v1215_v30 = vsub.f32 1.0, %v1213_v19  ;;  %v1377_v31 = vand.u32 2147483647, %v1375_v20  ;;  %v1539_v33 = vrot.slane %v2087_v13, %v2521_v53 }
  0x4f   : > { %2208 = vmatprep.subr.mxu0 %v719_v55  ;;  %2190 = vmatprep.mubr.msk.f32.mxu1 %vm370_vm0, %v2573_v3  ;;  %v335_v28 = vadd.f32 %v334_v25, %v2543_v32  ;;  %v1051_v34 = vmax.f32 %v1049_v22, 0.0  ;;  %v1380_v35 = vsub.f32 1.0, %v1378_v23  ;;  %v1212_v41 = vand.u32 2147483647, %v1210_v26 }
  0x50   : > { %2209 = vmatpush3.msra.mxu0 %v719_v55  ;;  %2210 = vmatprep.mubr.msk.f32.mxu0 %vm370_vm0, %v2468_v4  ;;  %v2097_v27 = vadd.f32 -0.5, %v1696_v24  ;;  %v1541_v42 = vsub.f32 %v1539_v33, %v2528_v60  ;;  %v2617_v43 = vsub.s32 3, %v2490_v21  ;;  %v1379_v45 = vsub.f32 1.0, %v1377_v31 }
  0x51   : > { %2191 = vmatmul.mubr.msk.f32.gmra.mxu1 %vm370_vm0, %v2580_v2  ;;  %2195 = vmatprep.subr.mxu1 %v548_v11  ;;  %v2016_v38 = vclamps-f32 %v335_v28, 1.0  ;;  %v1382_v44 = vmax.f32 %v1380_v35, 0.0  ;;  %v1214_v21 = vsub.f32 1.0, %v1212_v41  ;;  %v1540_v58 = vsub.f32 %v1539_v33, %v2518_v52 }
  0x52   : > { %2211 = vmatmul.mubr.msk.f32.vlgmr.msra.gmra.mxu0 %vm370_vm0, %v2559_v16  ;;  %2196 = vmatpush3.msra.mxu1 %v548_v11  ;;  %v1704_v37 = vrot.slane %v2097_v27, %v2521_v53  ;;  %v1217_v53 = vmax.f32 %v1215_v30, 0.0  ;;  %v1543_v50 = vand.u32 2147483647, %v1541_v42  ;;  %v1381_v51 = vmax.f32 %v1379_v45, 0.0 }
  0x53   : > { %2197 = vmatprep.mubr.msk.f32.mxu1 %vm370_vm0, %v2468_v4  ;;  %2213 = vmatprep.mubr.msk.f32.mxu0 %vm370_vm0, %v2471_v5  ;;  %339 = vst [vmem:[%s2497_s22 + $0x6] sm:$0x8] %v2016_v38  ;;  %v343_v40 = vadd.f32 1.0, %v2016_v38  ;;  %v1216_v59 = vmax.f32 %v1214_v21, 0.0  ;;  %v1542_v0 = vand.u32 2147483647, %v1540_v58 }
  0x54   : > { %2219 = vmatprep.subr.mxu1 %v887_v12  ;;  %2232 = vmatprep.subr.mxu0 %v1052_v17  ;;  %v1706_v39 = vsub.f32 %v1704_v37, %v2528_v60  ;;  %v1705_v56 = vsub.f32 %v1704_v37, %v2518_v52  ;;  %v1545_v61 = vsub.f32 1.0, %v1543_v50  ;;  %v522_v11 = vmul.f32 0.5, %v2545_v36 }
  0x55   : > { %2198 = vmatmul.mubr.msk.f32.vlgmr.msra.gmra.mxu1 %vm370_vm0, %v2559_v16  ;;  %2233 = vmatpush3.msra.mxu0 %v1052_v17  ;;  %v344_v48 = vmul.f32 8.0, %v343_v40  ;;  %v1544_v7 = vsub.f32 1.0, %v1542_v0  ;;  %v863_v22 = vmul.f32 0.5, %v2556_v9 }
  0x56   : > { %2214 = vmatmul.mubr.msk.f32.gmra.mxu0 %vm370_vm0, %v2562_v47  ;;  %2220 = vmatpush3.msra.mxu1 %v887_v12  ;;  %v1708_v46 = vand.u32 2147483647, %v1706_v39  ;;  %v1707_v55 = vand.u32 2147483647, %v1705_v56  ;;  %v1547_v63 = vmax.f32 %v1545_v61, 0.0  ;;  %v1359_v39 = vadd.f32 %v2583_v15, %v2556_v9 }
  0x57   : > { %2200 = vmatprep.mubr.msk.f32.mxu1 %vm370_vm0, %v2471_v5  ;;  %2216 = vmatprep.mubr.msk.f32.mxu0 %vm370_vm0, %v2573_v3  ;;  %v2018_v49 = vadd.f32 -0.5, %v344_v48  ;;  %v1546_v8 = vmax.f32 %v1544_v7, 0.0  ;;  %v864_v26 = vadd.f32 %v863_v22, %v2583_v15 }
  0x58   : > { %2221 = vmatprep.subr.mxu1 %v886_v29  ;;  %2234 = vmatprep.subr.mxu0 %v1051_v34  ;;  %v1710_v54 = vsub.f32 1.0, %v1708_v46  ;;  %v1709_v1 = vsub.f32 1.0, %v1707_v55 }
  0x59   : > { %2201 = vmatmul.mubr.msk.f32.gmra.mxu1 %vm370_vm0, %v2562_v47  ;;  %2235 = vmatpush3.msra.mxu0 %v1051_v34  ;;  %v2629_v57 = vrot.slane %v2018_v49, %v2617_v43  ;;  %v865_v28 = vadd.f32 %v864_v26, %v2543_v32 }
  0x5a   : > { %2217 = vmatmul.mubr.msk.f32.gmra.mxu0 %vm370_vm0, %v2580_v2  ;;  %2203 = vmatprep.mubr.msk.f32.mxu1 %vm370_vm0, %v2573_v3  ;;  %v1712_v62 = vmax.f32 %v1710_v54, 0.0  ;;  %v1711_v6 = vmax.f32 %v1709_v1, 0.0 }
  0x5b   : > { %2222 = vmatpush3.msra.mxu1 %v886_v29  ;;  %2236 = vmatprep.mubr.msk.f32.mxu0 %vm370_vm0, %v2468_v4  ;;  %v2046_v30 = vclamps-f32 %v865_v28, 1.0 }
  0x5c   : > { %2245 = vmatprep.subr.mxu1 %v1217_v53  ;;  %2258 = vmatprep.subr.mxu0 %v1382_v44 }
  0x5d   : > { %2204 = vmatmul.mubr.msk.f32.gmra.mxu1 %vm370_vm0, %v2580_v2  ;;  %869 = vst [vmem:[%s2497_s22 + $0x9] sm:$0x8] %v2046_v30  ;;  %v873_v33 = vadd.f32 1.0, %v2046_v30 }
  0x5e   : > { %2237 = vmatmul.mubr.msk.f32.vlgmr.msra.gmra.mxu0 %vm370_vm0, %v2559_v16  ;;  %2223 = vmatprep.mubr.msk.f32.mxu1 %vm370_vm0, %v2468_v4 }
  0x5f   : > { %2239 = vmatprep.mubr.msk.f32.mxu0 %vm370_vm0, %v2471_v5  ;;  %2259 = vmatpush3.msra.mxu0 %v1382_v44  ;;  %v874_v35 = vmul.f32 8.0, %v873_v33 }
  0x60   : > { %2260 = vmatprep.subr.mxu0 %v1381_v51 }
  0x61   : > { %2224 = vmatmul.mubr.msk.f32.vlgmr.msra.gmra.mxu1 %vm370_vm0, %v2559_v16  ;;  %2261 = vmatpush3.msra.mxu0 %v1381_v51  ;;  %v2048_v38 = vadd.f32 -0.5, %v874_v35 }
  0x62   : > { %2240 = vmatmul.mubr.msk.f32.gmra.mxu0 %vm370_vm0, %v2562_v47  ;;  %2246 = vmatpush3.msra.mxu1 %v1217_v53  ;;  %v1360_v53 = vadd.f32 %v1359_v39, %v2543_v32 }
  0x63   : > { %2226 = vmatprep.mubr.msk.f32.mxu1 %vm370_vm0, %v2471_v5  ;;  %2242 = vmatprep.mubr.msk.f32.mxu0 %vm370_vm0, %v2573_v3  ;;  %v2724_v40 = vrot.slane %v2048_v38, %v2617_v43 }
  0x64   : > { %2247 = vmatprep.subr.mxu1 %v1216_v59  ;;  %2284 = vmatprep.subr.mxu0 %v1712_v62  ;;  %v2076_v42 = vclamps-f32 %v1360_v53, 1.0 }
  0x65   : > { %2227 = vmatmul.mubr.msk.f32.gmra.mxu1 %vm370_vm0, %v2562_v47 }
  0x66   : > { %2243 = vmatmul.mubr.msk.f32.gmra.mxu0 %vm370_vm0, %v2580_v2  ;;  %2229 = vmatprep.mubr.msk.f32.mxu1 %vm370_vm0, %v2573_v3  ;;  %1364 = vst [vmem:[%s2497_s22 + $0xc] sm:$0x8] %v2076_v42  ;;  %v1368_v44 = vadd.f32 1.0, %v2076_v42 }
  0x67   : > { %2248 = vmatpush3.msra.mxu1 %v1216_v59  ;;  %2262 = vmatprep.mubr.msk.f32.mxu0 %vm370_vm0, %v2468_v4 }
  0x68   : > { %2271 = vmatprep.subr.mxu1 %v1547_v63  ;;  %v1369_v46 = vmul.f32 8.0, %v1368_v44 }
  0x69   : > { %2230 = vmatmul.mubr.msk.f32.gmra.mxu1 %vm370_vm0, %v2580_v2 }
  0x6a   : > { %2263 = vmatmul.mubr.msk.f32.vlgmr.msra.gmra.mxu0 %vm370_vm0, %v2559_v16  ;;  %2249 = vmatprep.mubr.msk.f32.mxu1 %vm370_vm0, %v2468_v4  ;;  %v2078_v49 = vadd.f32 -0.5, %v1369_v46 }
  0x6b   : > { %2265 = vmatprep.mubr.msk.f32.mxu0 %vm370_vm0, %v2471_v5  ;;  %2285 = vmatpush3.msra.mxu0 %v1712_v62 }
  0x6c   : > { %2286 = vmatprep.subr.mxu0 %v1711_v6  ;;  %v1386_v15 = vrot.slane %v2078_v49, %v2617_v43 }
  0x6d   : > { %2250 = vmatmul.mubr.msk.f32.vlgmr.msra.gmra.mxu1 %vm370_vm0, %v2559_v16  ;;  %2287 = vmatpush3.msra.mxu0 %v1711_v6 }
  0x6e   : > { %2266 = vmatmul.mubr.msk.f32.gmra.mxu0 %vm370_vm0, %v2562_v47  ;;  %2272 = vmatpush3.msra.mxu1 %v1547_v63  ;;  %v1387_v28 = vsub.f32 %v1386_v15, %v2518_v52 }
  0x6f   : > { %2252 = vmatprep.mubr.msk.f32.mxu1 %vm370_vm0, %v2471_v5  ;;  %2268 = vmatprep.mubr.msk.f32.mxu0 %vm370_vm0, %v2573_v3 }
  0x70   : > { %2273 = vmatprep.subr.mxu1 %v1546_v8  ;;  %v1389_v46 = vand.u32 2147483647, %v1387_v28 }
  0x71   : > { %2253 = vmatmul.mubr.msk.f32.gmra.mxu1 %vm370_vm0, %v2562_v47 }
  0x72   : > { %2269 = vmatmul.mubr.msk.f32.gmra.mxu0 %vm370_vm0, %v2580_v2  ;;  %2255 = vmatprep.mubr.msk.f32.mxu1 %vm370_vm0, %v2573_v3 }
  0x73   : > { %2274 = vmatpush3.msra.mxu1 %v1546_v8  ;;  %2288 = vmatprep.mubr.msk.f32.mxu0 %vm370_vm0, %v2468_v4 }
  0x75   : > { %2256 = vmatmul.mubr.msk.f32.gmra.mxu1 %vm370_vm0, %v2580_v2 }
  0x76   : > { %2289 = vmatmul.mubr.msk.f32.vlgmr.msra.gmra.mxu0 %vm370_vm0, %v2559_v16  ;;  %2275 = vmatprep.mubr.msk.f32.mxu1 %vm370_vm0, %v2468_v4  ;;  %v695_v4 = vrot.slane %v2545_v36, 1 }
  0x77   : > { %2291 = vmatprep.mubr.msk.f32.mxu0 %vm370_vm0, %v2471_v5 }
  0x78   : > { %v1194_v41 = vadd.f32 %v863_v22, %v695_v4  ;;  %v1689_v54 = vadd.f32 %v695_v4, %v2556_v9 }
  0x79   : > { %2276 = vmatmul.mubr.msk.f32.vlgmr.msra.gmra.mxu1 %vm370_vm0, %v2559_v16  ;;  %v697_v16 = vadd.f32 %v695_v4, %v2577_v10 }
  0x7a   : > { %2292 = vmatmul.mubr.msk.f32.gmra.mxu0 %vm370_vm0, %v2562_v47  ;;  %2278 = vmatprep.mubr.msk.f32.mxu1 %vm370_vm0, %v2471_v5  ;;  %v524_v5 = vrot.slane %v522_v11, 1  ;;  %v1195_v45 = vadd.f32 %v1194_v41, %v2543_v32  ;;  %v1690_v58 = vadd.f32 %v1689_v54, %v2543_v32 }
  0x7b   : > { %2294 = vmatprep.mubr.msk.f32.mxu0 %vm370_vm0, %v2573_v3  ;;  %v698_v12 = vadd.f32 %v697_v16, %v2543_v32 }
  0x7c   : > { %v1029_v24 = vadd.f32 %v863_v22, %v524_v5  ;;  %v2066_v48 = vclamps-f32 %v1195_v45, 1.0  ;;  %v1524_v59 = vadd.f32 %v524_v5, %v2556_v9  ;;  %v2096_v61 = vclamps-f32 %v1690_v58, 1.0 }
  0x7d   : > { %2279 = vmatmul.mubr.msk.f32.gmra.mxu1 %vm370_vm0, %v2562_v47  ;;  %v526_v47 = vadd.f32 %v524_v5, %v2577_v10  ;;  %v2036_v13 = vclamps-f32 %v698_v12, 1.0  ;;  %v363_v9 = vsub.f32 %v2629_v57, %v2528_v60 }
  0x7e   : > { %2295 = vmatmul.mubr.msk.f32.gmra.mxu0 %vm370_vm0, %v2580_v2  ;;  %2281 = vmatprep.mubr.msk.f32.mxu1 %vm370_vm0, %v2573_v3  ;;  %v1030_v25 = vadd.f32 %v1029_v24, %v2543_v32  ;;  %1199 = vst [vmem:[%s2497_s22 + $0xb] sm:$0x8] %v2066_v48  ;;  %v1203_v21 = vadd.f32 1.0, %v2066_v48  ;;  %v1525_v62 = vadd.f32 %v1524_v59, %v2543_v32  ;;  %1694 = vst [vmem:[%s2497_s22 + $0xe] sm:$0x8] %v2096_v61 }
  0x7f   : > { %v527_v14 = vadd.f32 %v526_v47, %v2543_v32  ;;  %702 = vst [vmem:[%s2497_s22 + $0x8] sm:$0x8] %v2036_v13  ;;  %v706_v36 = vadd.f32 1.0, %v2036_v13  ;;  %v1698_v55 = vadd.f32 1.0, %v2096_v61  ;;  %v362_v32 = vsub.f32 %v2629_v57, %v2518_v52 }
  0x80   : > { %v2056_v27 = vclamps-f32 %v1030_v25, 1.0  ;;  %v1204_v50 = vmul.f32 8.0, %v1203_v21  ;;  %v2086_v63 = vclamps-f32 %v1525_v62, 1.0  ;;  %v365_v13 = vand.u32 2147483647, %v363_v9 }
  0x81   : > { %2282 = vmatmul.mubr.msk.f32.gmra.mxu1 %vm370_vm0, %v2580_v2  ;;  %v2026_v17 = vclamps-f32 %v527_v14, 1.0  ;;  %v707_v18 = vmul.f32 8.0, %v706_v36  ;;  %v1699_v0 = vmul.f32 8.0, %v1698_v55  ;;  %v364_v14 = vand.u32 2147483647, %v362_v32 }
  0x82   : > { %1034 = vst [vmem:[%s2497_s22 + $0xa] sm:$0x8] %v2056_v27  ;;  %v1038_v29 = vadd.f32 1.0, %v2056_v27  ;;  %v2068_v51 = vadd.f32 -0.5, %v1204_v50  ;;  %1529 = vst [vmem:[%s2497_s22 + $0xd] sm:$0x8] %v2086_v63  ;;  %v893_v57 = vsub.f32 %v2724_v40, %v2528_v60 }
  0x83   : > { %531 = vst [vmem:[%s2497_s22 + $0x7] sm:$0x8] %v2026_v17  ;;  %v535_v3 = vadd.f32 1.0, %v2026_v17  ;;  %v2038_v19 = vadd.f32 -0.5, %v707_v18  ;;  %v1533_v1 = vadd.f32 1.0, %v2086_v63  ;;  %v2098_v7 = vadd.f32 -0.5, %v1699_v0 }
  0x84   : > { %v1039_v31 = vmul.f32 8.0, %v1038_v29  ;;  %v2733_v56 = vrot.slane %v2068_v51, %v2617_v43  ;;  %v366_v22 = vsub.f32 1.0, %v364_v14 }
  0x85   : > { %v536_v20 = vmul.f32 8.0, %v535_v3  ;;  %v724_v2 = vrot.slane %v2038_v19, %v2617_v43  ;;  %v1534_v6 = vmul.f32 8.0, %v1533_v1  ;;  %v1716_v8 = vrot.slane %v2098_v7, %v2617_v43 }
  0x86   : > { %v2058_v34 = vadd.f32 -0.5, %v1039_v31  ;;  %v367_v19 = vsub.f32 1.0, %v365_v13  ;;  %v895_v31 = vand.u32 2147483647, %v893_v57  ;;  %v1223_v33 = vsub.f32 %v2733_v56, %v2528_v60 }
  0x87   : > { %v2028_v23 = vadd.f32 -0.5, %v536_v20  ;;  %v2088_v4 = vadd.f32 -0.5, %v1534_v6  ;;  %v726_v16 = vsub.f32 %v724_v2, %v2528_v60  ;;  %v725_v5 = vsub.f32 %v724_v2, %v2518_v52 }
  0x88   : > { %v1056_v37 = vrot.slane %v2058_v34, %v2617_v43  ;;  %v369_v29 = vmax.f32 %v367_v19, 0.0  ;;  %v368_v34 = vmax.f32 %v366_v22, 0.0  ;;  %v1222_v38 = vsub.f32 %v2733_v56, %v2518_v52 }
  0x89   : > { %v553_v10 = vrot.slane %v2028_v23, %v2617_v43  ;;  %v2742_v11 = vrot.slane %v2088_v4, %v2617_v43  ;;  %v728_v43 = vand.u32 2147483647, %v726_v16  ;;  %v727_v17 = vand.u32 2147483647, %v725_v5 }
  0x8a   : > { %v1058_v36 = vsub.f32 %v1056_v37, %v2528_v60  ;;  %v1057_v20 = vsub.f32 %v1056_v37, %v2518_v52  ;;  %v892_v23 = vsub.f32 %v2724_v40, %v2518_v52  ;;  %v1718_v53 = vsub.f32 %v1716_v8, %v2528_v60 }
  0x8b   : > { %v555_v12 = vsub.f32 %v553_v10, %v2528_v60  ;;  %v554_v47 = vsub.f32 %v553_v10, %v2518_v52  ;;  %v730_v24 = vsub.f32 1.0, %v728_v43  ;;  %v1388_v10 = vsub.f32 %v1386_v15, %v2528_v60 }
  0x8c   : > { %v1060_v2 = vand.u32 2147483647, %v1058_v36  ;;  %v729_v25 = vsub.f32 1.0, %v727_v17  ;;  %v1059_v30 = vand.u32 2147483647, %v1057_v20  ;;  %v1717_v41 = vsub.f32 %v1716_v8, %v2518_v52 }
  0x8d   : > { %v557_v18 = vand.u32 2147483647, %v555_v12  ;;  %v556_v3 = vand.u32 2147483647, %v554_v47  ;;  %v894_v37 = vand.u32 2147483647, %v892_v23  ;;  %v1553_v51 = vsub.f32 %v2742_v11, %v2528_v60 }
  0x8e   : > { %v1062_v35 = vsub.f32 1.0, %v1060_v2  ;;  %v2764_v39 = vmax.f32 %v730_v24, 0.0  ;;  %v1390_v40 = vand.u32 2147483647, %v1388_v10  ;;  %v2768_v42 = vmax.f32 %v729_v25, 0.0 }
  0x8f   : > { %v559_v26 = vsub.f32 1.0, %v557_v18  ;;  %v558_v27 = vsub.f32 1.0, %v556_v3  ;;  %v1061_v21 = vsub.f32 1.0, %v1059_v30  ;;  %v897_v15 = vsub.f32 1.0, %v895_v31 }
  0x90   : > { %v1225_v50 = vand.u32 2147483647, %v1223_v33  ;;  %v2776_v56 = vmax.f32 %v1062_v35, 0.0  ;;  %v896_v58 = vsub.f32 1.0, %v894_v37  ;;  %v1224_v59 = vand.u32 2147483647, %v1222_v38 }
  0x91   : > { %v2770_v44 = vmax.f32 %v559_v26, 0.0  ;;  %v2772_v45 = vmax.f32 %v558_v27, 0.0  ;;  %v1392_v55 = vsub.f32 1.0, %v1390_v40  ;;  %v1720_v63 = vand.u32 2147483647, %v1718_v53 }
  0x92   : > { %v1719_v0 = vand.u32 2147483647, %v1717_v41  ;;  %v1552_v1 = vsub.f32 %v2742_v11, %v2518_v52  ;;  %v1391_v4 = vsub.f32 1.0, %v1389_v46  ;;  %v2780_v9 = vmax.f32 %v1061_v21, 0.0 }
  0x93   : > { %v2782_v60 = vmax.f32 %v897_v15, 0.0  ;;  %v1227_v32 = vsub.f32 1.0, %v1225_v50  ;;  %v1555_v16 = vand.u32 2147483647, %v1553_v51  ;;  %v2784_v13 = vmax.f32 %v896_v58, 0.0 }
  0x94   : > { %v1226_v14 = vsub.f32 1.0, %v1224_v59  ;;  %v2786_v43 = vmax.f32 %v1392_v55, 0.0  ;;  %v1722_v52 = vsub.f32 1.0, %v1720_v63  ;;  %v1721_v11 = vsub.f32 1.0, %v1719_v0 }
  0x95   : > { %v1554_v17 = vand.u32 2147483647, %v1552_v1  ;;  %v2789_v57 = vmax.f32 %v1391_v4, 0.0  ;;  %v2791_v24 = vmax.f32 %v1227_v32, 0.0  ;;  %v1557_v10 = vsub.f32 1.0, %v1555_v16 }
  0x96   : > { %v2794_v30 = vmax.f32 %v1226_v14, 0.0  ;;  %v2796_v35 = vmax.f32 %v1722_v52, 0.0  ;;  %v2798_v37 = vmax.f32 %v1721_v11, 0.0 }
  0x97   : > { %v2803_v15 = vmax.f32 %v1557_v10, 0.0 }
 0x10c   : > { %v2186_v48 = vpop.f32.mrf.mxu0  ;;  %v2189_v49 = vpop.f32.mrf.mxu1 }
 0x10d   : > { %v485_v54 = vmul.f32 %v2186_v48, %v369_v29  ;;  %v495_v7 = vmul.f32 %v2189_v49, %v369_v29 }
 0x10e   : > { %v455_v61 = vpop.f32.mrf.mxu0  ;;  %v465_v62 = vpop.f32.mrf.mxu1 }
 0x10f   : > { %v484_v6 = vmul.f32 %v455_v61, %v368_v34  ;;  %v494_v8 = vmul.f32 %v465_v62, %v368_v34 }
 0x111   : > { %v486_v5 = vadd.f32 %v485_v54, %v484_v6  ;;  %v496_v12 = vadd.f32 %v495_v7, %v494_v8  ;;  %v2192_v47 = vpop.f32.mrf.mxu1 }
 0x112   : > { %v2212_v36 = vpop.f32.mrf.mxu0  ;;  %v505_v22 = vmul.f32 %v2192_v47, %v369_v29  ;;  %v1556_v29 = vsub.f32 1.0, %v1554_v17 }
 0x113   : > { %v487_v18 = vrot.slane %v486_v5, 4  ;;  %v497_v3 = vrot.slane %v496_v12, 4  ;;  %v829_v19 = vmul.f32 %v2212_v36, %v2764_v39  ;;  %v475_v20 = vpop.f32.mrf.mxu1 }
 0x114   : > { %v504_v2 = vmul.f32 %v475_v20, %v368_v34  ;;  %v799_v23 = vpop.f32.mrf.mxu0  ;;  %v2808_v0 = vmax.f32 %v1556_v29, 0.0 }
 0x115   : > { %v488_v25 = vadd.f32 %v487_v18, %v486_v5  ;;  %v498_v26 = vadd.f32 %v497_v3, %v496_v12  ;;  %v828_v27 = vmul.f32 %v799_v23, %v2768_v42  ;;  %v2199_v28 = vpop.f32.mrf.mxu1 }
 0x116   : > { %v506_v31 = vadd.f32 %v505_v22, %v504_v2  ;;  %v2215_v33 = vpop.f32.mrf.mxu0  ;;  %v658_v48 = vmul.f32 %v2199_v28, %v2770_v44 }
 0x117   : > { %v489_v34 = vrot.slane %v488_v25, 2  ;;  %v499_v38 = vrot.slane %v498_v26, 2  ;;  %v830_v40 = vadd.f32 %v829_v19, %v828_v27  ;;  %v839_v53 = vmul.f32 %v2215_v33, %v2764_v39  ;;  %v628_v41 = vpop.f32.mrf.mxu1 }
 0x118   : > { %v507_v46 = vrot.slane %v506_v31, 4  ;;  %v657_v49 = vmul.f32 %v628_v41, %v2772_v45  ;;  %v809_v21 = vpop.f32.mrf.mxu0 }
 0x119   : > { %v490_v50 = vadd.f32 %v489_v34, %v488_v25  ;;  %v500_v51 = vadd.f32 %v499_v38, %v498_v26  ;;  %v831_v54 = vrot.slane %v830_v40, 4  ;;  %v838_v58 = vmul.f32 %v809_v21, %v2768_v42  ;;  %v2202_v59 = vpop.f32.mrf.mxu1 }
 0x11a   : > { %v508_v61 = vadd.f32 %v507_v46, %v506_v31  ;;  %v659_v62 = vadd.f32 %v658_v48, %v657_v49  ;;  %v668_v55 = vmul.f32 %v2202_v59, %v2770_v44  ;;  %v2218_v63 = vpop.f32.mrf.mxu0 }
 0x11b   : > { %v491_v1 = vrot.slane %v490_v50, 1  ;;  %v501_v7 = vrot.slane %v500_v51, 1  ;;  %v832_v6 = vadd.f32 %v831_v54, %v830_v40  ;;  %v840_v8 = vadd.f32 %v839_v53, %v838_v58  ;;  %v638_v4 = vpop.f32.mrf.mxu1 }
 0x11c   : > { %v509_v32 = vrot.slane %v508_v61, 2  ;;  %v660_v16 = vrot.slane %v659_v62, 4  ;;  %v849_v5 = vmul.f32 %v2218_v63, %v2764_v39  ;;  %v667_v12 = vmul.f32 %v638_v4, %v2772_v45  ;;  %v819_v47 = vpop.f32.mrf.mxu0 }
 0x11d   : > { %v492_v14 = vadd.f32 %v491_v1, %v490_v50  ;;  %v502_v36 = vadd.f32 %v501_v7, %v500_v51  ;;  %v833_v52 = vrot.slane %v832_v6, 2  ;;  %v841_v11 = vrot.slane %v840_v8, 4  ;;  %v2205_v17 = vpop.f32.mrf.mxu1 }
 0x11e   : > { %v510_v18 = vadd.f32 %v509_v32, %v508_v61  ;;  %v661_v3 = vadd.f32 %v660_v16, %v659_v62  ;;  %v669_v19 = vadd.f32 %v668_v55, %v667_v12  ;;  %v848_v20 = vmul.f32 %v819_v47, %v2768_v42  ;;  %v2238_v22 = vpop.f32.mrf.mxu0 }
 0x11f   : > { %493 = vst [vmem:[%s2813_s25] sm:$0x1] %v492_v14  ;;  %503 = vst [vmem:[%s2813_s25 + $0x1] sm:$0x1] %v502_v36  ;;  %v834_v2 = vadd.f32 %v833_v52, %v832_v6  ;;  %v842_v23 = vadd.f32 %v841_v11, %v840_v8  ;;  %v678_v39 = vmul.f32 %v2205_v17, %v2770_v44  ;;  %v648_v25 = vpop.f32.mrf.mxu1 }
 0x120   : > { %v1161_v10 = vmul.f32 %v2238_v22, %v2776_v56  ;;  %v511_v26 = vrot.slane %v510_v18, 1  ;;  %v662_v27 = vrot.slane %v661_v3, 2  ;;  %v670_v28 = vrot.slane %v669_v19, 4  ;;  %v1131_v33 = vpop.f32.mrf.mxu0 }
 0x121   : > { %v850_v31 = vadd.f32 %v849_v5, %v848_v20  ;;  %v835_v29 = vrot.slane %v834_v2, 1  ;;  %v843_v34 = vrot.slane %v842_v23, 2  ;;  %v677_v42 = vmul.f32 %v648_v25, %v2772_v45  ;;  %v2225_v40 = vpop.f32.mrf.mxu1 }
 0x122   : > { %v1160_v38 = vmul.f32 %v1131_v33, %v2780_v9  ;;  %v512_v53 = vadd.f32 %v511_v26, %v510_v18  ;;  %v663_v41 = vadd.f32 %v662_v27, %v661_v3  ;;  %v671_v44 = vadd.f32 %v670_v28, %v669_v19  ;;  %v2241_v48 = vpop.f32.mrf.mxu0 }
 0x123   : > { %v851_v46 = vrot.slane %v850_v31, 4  ;;  %v836_v49 = vadd.f32 %v835_v29, %v834_v2  ;;  %v844_v21 = vadd.f32 %v843_v34, %v842_v23  ;;  %v679_v50 = vadd.f32 %v678_v39, %v677_v42  ;;  %v966_v54 = vpop.f32.mrf.mxu1 }
 0x124   : > { %v1162_v51 = vadd.f32 %v1161_v10, %v1160_v38  ;;  %513 = vst [vmem:[%s2813_s25 + $0x2] sm:$0x1] %v512_v53  ;;  %v664_v58 = vrot.slane %v663_v41, 1  ;;  %v672_v59 = vrot.slane %v671_v44, 2  ;;  %v996_v45 = vmul.f32 %v2225_v40, %v2782_v60  ;;  %v1141_v62 = vpop.f32.mrf.mxu0 }
 0x125   : > { %v852_v61 = vadd.f32 %v851_v46, %v850_v31  ;;  %837 = vst [vmem:[%s2813_s25 + $0x6] sm:$0x1] %v836_v49  ;;  %v845_v55 = vrot.slane %v844_v21, 1  ;;  %v680_v63 = vrot.slane %v679_v50, 4  ;;  %v1171_v7 = vmul.f32 %v2241_v48, %v2776_v56  ;;  %v2228_v6 = vpop.f32.mrf.mxu1 }
 0x126   : > { %v1163_v1 = vrot.slane %v1162_v51, 4  ;;  %v665_v8 = vadd.f32 %v664_v58, %v663_v41  ;;  %v673_v4 = vadd.f32 %v672_v59, %v671_v44  ;;  %v995_v16 = vmul.f32 %v966_v54, %v2784_v13  ;;  %v2244_v5 = vpop.f32.mrf.mxu0 }
 0x127   : > { %v853_v32 = vrot.slane %v852_v61, 2  ;;  %v846_v12 = vadd.f32 %v845_v55, %v844_v21  ;;  %v681_v47 = vadd.f32 %v680_v63, %v679_v50  ;;  %v1170_v36 = vmul.f32 %v1141_v62, %v2780_v9  ;;  %v976_v52 = vpop.f32.mrf.mxu1 }
 0x128   : > { %v1164_v14 = vadd.f32 %v1163_v1, %v1162_v51  ;;  %666 = vst [vmem:[%s2813_s25 + $0x3] sm:$0x1] %v665_v8  ;;  %v674_v11 = vrot.slane %v673_v4, 1  ;;  %v997_v18 = vadd.f32 %v996_v45, %v995_v16  ;;  %v1006_v3 = vmul.f32 %v2228_v6, %v2782_v60  ;;  %v1151_v19 = vpop.f32.mrf.mxu0 }
 0x129   : > { %v854_v17 = vadd.f32 %v853_v32, %v852_v61  ;;  %847 = vst [vmem:[%s2813_s25 + $0x7] sm:$0x1] %v846_v12  ;;  %v682_v20 = vrot.slane %v681_v47, 2  ;;  %v1172_v2 = vadd.f32 %v1171_v7, %v1170_v36  ;;  %v1181_v23 = vmul.f32 %v2244_v5, %v2776_v56  ;;  %v2231_v39 = vpop.f32.mrf.mxu1 }
 0x12a   : > { %v1165_v22 = vrot.slane %v1164_v14, 2  ;;  %v675_v10 = vadd.f32 %v674_v11, %v673_v4  ;;  %v998_v26 = vrot.slane %v997_v18, 4  ;;  %v1005_v27 = vmul.f32 %v976_v52, %v2784_v13  ;;  %v2264_v28 = vpop.f32.mrf.mxu0 }
 0x12b   : > { %v855_v25 = vrot.slane %v854_v17, 1  ;;  %v683_v31 = vadd.f32 %v682_v20, %v681_v47  ;;  %v1173_v29 = vrot.slane %v1172_v2, 4  ;;  %v1180_v34 = vmul.f32 %v1151_v19, %v2780_v9  ;;  %v986_v42 = vpop.f32.mrf.mxu1 }
 0x12c   : > { %v1166_v33 = vadd.f32 %v1165_v22, %v1164_v14  ;;  %676 = vst [vmem:[%s2813_s25 + $0x4] sm:$0x1] %v675_v10  ;;  %v999_v40 = vadd.f32 %v998_v26, %v997_v18  ;;  %v1007_v53 = vadd.f32 %v1006_v3, %v1005_v27  ;;  %v1016_v56 = vmul.f32 %v2231_v39, %v2782_v60  ;;  %v1461_v41 = vpop.f32.mrf.mxu0 }
 0x12d   : > { %v856_v38 = vadd.f32 %v855_v25, %v854_v17  ;;  %v684_v44 = vrot.slane %v683_v31, 1  ;;  %v1174_v48 = vadd.f32 %v1173_v29, %v1172_v2  ;;  %v1182_v49 = vadd.f32 %v1181_v23, %v1180_v34  ;;  %v2251_v21 = vpop.f32.mrf.mxu1 }
 0x12e   : > { %v1167_v46 = vrot.slane %v1166_v33, 1  ;;  %v1000_v50 = vrot.slane %v999_v40, 2  ;;  %v1008_v51 = vrot.slane %v1007_v53, 4  ;;  %v1491_v9 = vmul.f32 %v2264_v28, %v2786_v43  ;;  %v2267_v58 = vpop.f32.mrf.mxu0 }
 0x12f   : > { %857 = vst [vmem:[%s2813_s25 + $0x8] sm:$0x1] %v856_v38  ;;  %v1015_v54 = vmul.f32 %v986_v42, %v2784_v13  ;;  %v685_v59 = vadd.f32 %v684_v44, %v683_v31  ;;  %v1175_v45 = vrot.slane %v1174_v48, 2  ;;  %v1183_v60 = vrot.slane %v1182_v49, 4  ;;  %v1296_v62 = vpop.f32.mrf.mxu1 }
 0x130   : > { %v1168_v61 = vadd.f32 %v1167_v46, %v1166_v33  ;;  %v1001_v55 = vadd.f32 %v1000_v50, %v999_v40  ;;  %v1009_v63 = vadd.f32 %v1008_v51, %v1007_v53  ;;  %v1490_v7 = vmul.f32 %v1461_v41, %v2789_v57  ;;  %v1471_v6 = vpop.f32.mrf.mxu0 }
 0x131   : > { %v1017_v1 = vadd.f32 %v1016_v56, %v1015_v54  ;;  %686 = vst [vmem:[%s2813_s25 + $0x5] sm:$0x1] %v685_v59  ;;  %v1176_v8 = vadd.f32 %v1175_v45, %v1174_v48  ;;  %v1184_v4 = vadd.f32 %v1183_v60, %v1182_v49  ;;  %v1326_v32 = vmul.f32 %v2251_v21, %v2791_v24  ;;  %v2254_v16 = vpop.f32.mrf.mxu1 }
 0x132   : > { %1169 = vst [vmem:[%s2813_s25 + $0xc] sm:$0x1] %v1168_v61  ;;  %v1501_v13 = vmul.f32 %v2267_v58, %v2786_v43  ;;  %v1002_v5 = vrot.slane %v1001_v55, 1  ;;  %v1010_v12 = vrot.slane %v1009_v63, 2  ;;  %v1492_v14 = vadd.f32 %v1491_v9, %v1490_v7  ;;  %v2270_v36 = vpop.f32.mrf.mxu0 }
 0x133   : > { %v1018_v47 = vrot.slane %v1017_v1, 4  ;;  %v1177_v52 = vrot.slane %v1176_v8, 1  ;;  %v1185_v11 = vrot.slane %v1184_v4, 2  ;;  %v1325_v17 = vmul.f32 %v1296_v62, %v2794_v30  ;;  %v1306_v3 = vpop.f32.mrf.mxu1 }
 0x134   : > { %v1500_v18 = vmul.f32 %v1471_v6, %v2789_v57  ;;  %v1003_v19 = vadd.f32 %v1002_v5, %v1001_v55  ;;  %v1011_v20 = vadd.f32 %v1010_v12, %v1009_v63  ;;  %v1493_v2 = vrot.slane %v1492_v14, 4  ;;  %v1481_v23 = vpop.f32.mrf.mxu0 }
 0x135   : > { %v1019_v22 = vadd.f32 %v1018_v47, %v1017_v1  ;;  %v1178_v39 = vadd.f32 %v1177_v52, %v1176_v8  ;;  %v1186_v10 = vadd.f32 %v1185_v11, %v1184_v4  ;;  %v1327_v25 = vadd.f32 %v1326_v32, %v1325_v17  ;;  %v2257_v27 = vpop.f32.mrf.mxu1 }
 0x136   : > { %v1502_v26 = vadd.f32 %v1501_v13, %v1500_v18  ;;  %1004 = vst [vmem:[%s2813_s25 + $0x9] sm:$0x1] %v1003_v19  ;;  %v1012_v28 = vrot.slane %v1011_v20, 1  ;;  %v1494_v33 = vadd.f32 %v1493_v2, %v1492_v14  ;;  %v1336_v29 = vmul.f32 %v2254_v16, %v2791_v24  ;;  %v2290_v34 = vpop.f32.mrf.mxu0 }
 0x137   : > { %v1020_v31 = vrot.slane %v1019_v22, 2  ;;  %1179 = vst [vmem:[%s2813_s25 + $0xd] sm:$0x1] %v1178_v39  ;;  %v1187_v42 = vrot.slane %v1186_v10, 1  ;;  %v1328_v38 = vrot.slane %v1327_v25, 4  ;;  %v1511_v53 = vmul.f32 %v2270_v36, %v2786_v43  ;;  %v1316_v56 = vpop.f32.mrf.mxu1 }
 0x138   : > { %v1503_v40 = vrot.slane %v1502_v26, 4  ;;  %v1013_v41 = vadd.f32 %v1012_v28, %v1011_v20  ;;  %v1495_v46 = vrot.slane %v1494_v33, 2  ;;  %v1335_v48 = vmul.f32 %v1306_v3, %v2794_v30  ;;  %v1791_v49 = vpop.f32.mrf.mxu0 }
 0x139   : > { %v1021_v44 = vadd.f32 %v1020_v31, %v1019_v22  ;;  %v1188_v21 = vadd.f32 %v1187_v42, %v1186_v10  ;;  %v1329_v50 = vadd.f32 %v1328_v38, %v1327_v25  ;;  %v1510_v9 = vmul.f32 %v1481_v23, %v2789_v57  ;;  %v2277_v54 = vpop.f32.mrf.mxu1 }
 0x13a   : > { %v1504_v51 = vadd.f32 %v1503_v40, %v1502_v26  ;;  %1014 = vst [vmem:[%s2813_s25 + $0xa] sm:$0x1] %v1013_v41  ;;  %v1496_v59 = vadd.f32 %v1495_v46, %v1494_v33  ;;  %v1337_v61 = vadd.f32 %v1336_v29, %v1335_v48  ;;  %v1346_v43 = vmul.f32 %v2257_v27, %v2791_v24  ;;  %v2293_v45 = vpop.f32.mrf.mxu0 }
 0x13b   : > { %v1022_v58 = vrot.slane %v1021_v44, 1  ;;  %1189 = vst [vmem:[%s2813_s25 + $0xe] sm:$0x1] %v1188_v21  ;;  %v1330_v60 = vrot.slane %v1329_v50, 2  ;;  %v1512_v55 = vadd.f32 %v1511_v53, %v1510_v9  ;;  %v1821_v63 = vmul.f32 %v2290_v34, %v2796_v35  ;;  %v1626_v1 = vpop.f32.mrf.mxu1 }
 0x13c   : > { %v1505_v62 = vrot.slane %v1504_v51, 2  ;;  %v1497_v6 = vrot.slane %v1496_v59, 1  ;;  %v1338_v8 = vrot.slane %v1337_v61, 4  ;;  %v1345_v57 = vmul.f32 %v1316_v56, %v2794_v30  ;;  %v1801_v4 = vpop.f32.mrf.mxu0 }
 0x13d   : > { %v1023_v7 = vadd.f32 %v1022_v58, %v1021_v44  ;;  %v1331_v32 = vadd.f32 %v1330_v60, %v1329_v50  ;;  %v1513_v16 = vrot.slane %v1512_v55, 4  ;;  %v1820_v24 = vmul.f32 %v1791_v49, %v2798_v37  ;;  %v2280_v5 = vpop.f32.mrf.mxu1 }
 0x13e   : > { %v1506_v13 = vadd.f32 %v1505_v62, %v1504_v51  ;;  %v1498_v12 = vadd.f32 %v1497_v6, %v1496_v59  ;;  %v1339_v47 = vadd.f32 %v1338_v8, %v1337_v61  ;;  %v1347_v14 = vadd.f32 %v1346_v43, %v1345_v57  ;;  %v2296_v52 = vpop.f32.mrf.mxu0 }
 0x13f   : > { %1024 = vst [vmem:[%s2813_s25 + $0xb] sm:$0x1] %v1023_v7  ;;  %v1656_v36 = vmul.f32 %v2277_v54, %v2803_v15  ;;  %v1332_v11 = vrot.slane %v1331_v32, 1  ;;  %v1514_v18 = vadd.f32 %v1513_v16, %v1512_v55  ;;  %v1822_v3 = vadd.f32 %v1821_v63, %v1820_v24  ;;  %v1636_v30 = vpop.f32.mrf.mxu1 }
 0x140   : > { %v1507_v17 = vrot.slane %v1506_v13, 1  ;;  %1499 = vst [vmem:[%s2813_s25 + $0x12] sm:$0x1] %v1498_v12  ;;  %v1340_v19 = vrot.slane %v1339_v47, 2  ;;  %v1348_v20 = vrot.slane %v1347_v14, 4  ;;  %v1831_v22 = vmul.f32 %v2293_v45, %v2796_v35  ;;  %v1811_v33 = vpop.f32.mrf.mxu0 }
 0x141   : > { %v1655_v2 = vmul.f32 %v1626_v1, %v2808_v0  ;;  %v1333_v23 = vadd.f32 %v1332_v11, %v1331_v32  ;;  %v1515_v10 = vrot.slane %v1514_v18, 2  ;;  %v1823_v25 = vrot.slane %v1822_v3, 4  ;;  %v2283_v29 = vpop.f32.mrf.mxu1 }
 0x142   : > { %v1508_v39 = vadd.f32 %v1507_v17, %v1506_v13  ;;  %v1341_v26 = vadd.f32 %v1340_v19, %v1339_v47  ;;  %v1349_v27 = vadd.f32 %v1348_v20, %v1347_v14  ;;  %v1830_v31 = vmul.f32 %v1801_v4, %v2798_v37 }
 0x143   : > { %v1657_v28 = vadd.f32 %v1656_v36, %v1655_v2  ;;  %1334 = vst [vmem:[%s2813_s25 + $0xf] sm:$0x1] %v1333_v23  ;;  %v1516_v34 = vadd.f32 %v1515_v10, %v1514_v18  ;;  %v1824_v42 = vadd.f32 %v1823_v25, %v1822_v3  ;;  %v1666_v38 = vmul.f32 %v2280_v5, %v2803_v15  ;;  %v1646_v58 = vpop.f32.mrf.mxu1 }
 0x144   : > { %1509 = vst [vmem:[%s2813_s25 + $0x13] sm:$0x1] %v1508_v39  ;;  %v1841_v40 = vmul.f32 %v2296_v52, %v2796_v35  ;;  %v1342_v53 = vrot.slane %v1341_v26, 1  ;;  %v1350_v56 = vrot.slane %v1349_v27, 2  ;;  %v1832_v44 = vadd.f32 %v1831_v22, %v1830_v31 }
 0x145   : > { %v1658_v41 = vrot.slane %v1657_v28, 4  ;;  %v1517_v46 = vrot.slane %v1516_v34, 1  ;;  %v1825_v48 = vrot.slane %v1824_v42, 2  ;;  %v1665_v49 = vmul.f32 %v1636_v30, %v2808_v0 }
 0x146   : > { %v1840_v21 = vmul.f32 %v1811_v33, %v2798_v37  ;;  %v1343_v50 = vadd.f32 %v1342_v53, %v1341_v26  ;;  %v1351_v51 = vadd.f32 %v1350_v56, %v1349_v27  ;;  %v1833_v54 = vrot.slane %v1832_v44, 4 }
 0x147   : > { %v1659_v9 = vadd.f32 %v1658_v41, %v1657_v28  ;;  %v1518_v59 = vadd.f32 %v1517_v46, %v1516_v34  ;;  %v1826_v61 = vadd.f32 %v1825_v48, %v1824_v42  ;;  %v1667_v35 = vadd.f32 %v1666_v38, %v1665_v49 }
 0x148   : > { %v1842_v43 = vadd.f32 %v1841_v40, %v1840_v21  ;;  %1344 = vst [vmem:[%s2813_s25 + $0x10] sm:$0x1] %v1343_v50  ;;  %v1352_v45 = vrot.slane %v1351_v51, 1  ;;  %v1834_v62 = vadd.f32 %v1833_v54, %v1832_v44  ;;  %v1676_v55 = vmul.f32 %v2283_v29, %v2803_v15 }
 0x149   : > { %v1660_v60 = vrot.slane %v1659_v9, 2  ;;  %1519 = vst [vmem:[%s2813_s25 + $0x14] sm:$0x1] %v1518_v59  ;;  %v1827_v63 = vrot.slane %v1826_v61, 1  ;;  %v1668_v37 = vrot.slane %v1667_v35, 4  ;;  %v1675_v7 = vmul.f32 %v1646_v58, %v2808_v0 }
 0x14a   : > { %v1843_v1 = vrot.slane %v1842_v43, 4  ;;  %v1353_v6 = vadd.f32 %v1352_v45, %v1351_v51  ;;  %v1835_v57 = vrot.slane %v1834_v62, 2 }
 0x14b   : > { %v1661_v8 = vadd.f32 %v1660_v60, %v1659_v9  ;;  %v1828_v4 = vadd.f32 %v1827_v63, %v1826_v61  ;;  %v1669_v32 = vadd.f32 %v1668_v37, %v1667_v35  ;;  %v1677_v16 = vadd.f32 %v1676_v55, %v1675_v7 }
 0x14c   : > { %v1844_v13 = vadd.f32 %v1843_v1, %v1842_v43  ;;  %1354 = vst [vmem:[%s2813_s25 + $0x11] sm:$0x1] %v1353_v6  ;;  %v1836_v5 = vadd.f32 %v1835_v57, %v1834_v62 }
 0x14d   : > { %v1662_v24 = vrot.slane %v1661_v8, 1  ;;  %1829 = vst [vmem:[%s2813_s25 + $0x18] sm:$0x1] %v1828_v4  ;;  %v1670_v15 = vrot.slane %v1669_v32, 2  ;;  %v1678_v47 = vrot.slane %v1677_v16, 4 }
 0x14e   : > { %v1845_v12 = vrot.slane %v1844_v13, 2  ;;  %v1837_v0 = vrot.slane %v1836_v5, 1 }
 0x14f   : > { %v1663_v14 = vadd.f32 %v1662_v24, %v1661_v8  ;;  %v1671_v36 = vadd.f32 %v1670_v15, %v1669_v32  ;;  %v1679_v11 = vadd.f32 %v1678_v47, %v1677_v16 }
 0x150   : > { %v1846_v52 = vadd.f32 %v1845_v12, %v1844_v13  ;;  %v1838_v17 = vadd.f32 %v1837_v0, %v1836_v5 }
 0x151   : > { %1664 = vst [vmem:[%s2813_s25 + $0x15] sm:$0x1] %v1663_v14  ;;  %v1672_v18 = vrot.slane %v1671_v36, 1  ;;  %v1680_v30 = vrot.slane %v1679_v11, 2 }
 0x152   : > { %v1847_v3 = vrot.slane %v1846_v52, 1  ;;  %1839 = vst [vmem:[%s2813_s25 + $0x19] sm:$0x1] %v1838_v17 }
 0x153   : > { %v1673_v19 = vadd.f32 %v1672_v18, %v1671_v36  ;;  %v1681_v22 = vadd.f32 %v1680_v30, %v1679_v11 }
 0x154   : > { %v1848_v20 = vadd.f32 %v1847_v3, %v1846_v52 }
 0x155   : > { %1674 = vst [vmem:[%s2813_s25 + $0x16] sm:$0x1] %v1673_v19  ;;  %v1682_v2 = vrot.slane %v1681_v22, 1 }
 0x156   : > { %1849 = vst [vmem:[%s2813_s25 + $0x1a] sm:$0x1] %v1848_v20 }
 0x157   : > { %v1683_v23 = vadd.f32 %v1682_v2, %v1681_v22 }
 0x159   : > { %1684 = vst [vmem:[%s2813_s25 + $0x17] sm:$0x1] %v1683_v23 }
 0x15a PF: > { %s16_s17 = sadd.s32 1, %s2379_s17   ;;  %s2899_s15 = smov %s2375_s16 }
 0x15b   : > { %p13_p2 = scmp.ge.s32.totalorder %s16_s17, 4   ;;  %s2900_s16 = smov %s2902_s19 }
 0x15d   :  { %15 = sbr.rel (!%p13_p2) target bundleno = 2 (0x2), region = 82 }
 0x162   :  { %1899 = vsyncpa [#allocation3], 1 }
 0x163   :  { %1901 = vsyncpa [#allocation3 + $0x1], 1 }

</bundles_post_ra>
